<compile_context>
chip_gen: v5e
topology: v5e:2x2
jax: 0.10.0
libtpu: 0.0.40
codegen_flags: <defaults>
</compile_context>

<pallas_src>
import functools

import jax
import jax.numpy as jnp
import numpy as np
from jax.experimental import pallas as pl
from jax.experimental.pallas import tpu as pltpu

LANE = 128
_INV_SQRT2 = np.float32(1.0 / np.sqrt(2.0))


def _round_up(v, m):
    return (v + m - 1) // m * m


# ------------------------------ fused kernel --------------------------------

def _mlp_fused_kernel(x_ref, m_ref, w1_ref, b1_ref, wd_ref, bd_ref,
                      w2_ref, b2_ref, o_ref, *, H, W):
    """One batch image per grid step.

    x_ref : (H*W, Cp)    tokens, channels lane-padded to 128
    m_ref : (H*W, 16)    per-token validity of the 9 conv taps (cols 0..8)
    w1_ref: (Cp, Hid)    fc1 weight (transposed + padded)
    b1_ref: (1, Hid)
    wd_ref: (3, 3, Hid)  depthwise 3x3 weights
    bd_ref: (1, Hid)
    w2_ref: (Hid, Op)    fc2 weight (transposed + padded)
    b2_ref: (1, Op)
    o_ref : (H*W, Op)
    """
    HW = H * W

    # ---- fc1 (MXU, f32 accumulate); hidden stays on-chip --------------------
    x = x_ref[...]
    h = jnp.dot(x, w1_ref[...], preferred_element_type=jnp.float32) + b1_ref[...]

    # ---- depthwise 3x3 conv: sublane rolls (XLU) + boundary masks -----------
    wd = wd_ref[...]                 # hoisted: load (3,3,Hid) weights once
    acc = h * wd[1, 1, :]            # center tap needs no shift / mask
    for ki in range(3):
        for kj in range(3):
            di, dj = ki - 1, kj - 1
            if di == 0 and dj == 0:
                continue
            off = di * W + dj                                  # token offset
            shifted = pltpu.roll(h, shift=(-off) % HW, axis=0)  # XLU rotate
            c = ki * 3 + kj
            mask = m_ref[:, c:c + 1]                            # (HW, 1)
            acc = acc + shifted * mask * wd[ki, kj, :]
    acc = acc + bd_ref[...]

    # ---- exact GELU (matches torch nn.GELU default) --------------------------
    g = 0.5 * acc * (1.0 + jax.lax.erf(acc * _INV_SQRT2))

    # ---- fc2 (MXU, lane-dense output) ----------------------------------------
    out = jnp.dot(g, w2_ref[...], preferred_element_type=jnp.float32) + b2_ref[...]
    o_ref[...] = out.astype(o_ref.dtype)


# --------------------------------- wrapper ----------------------------------

def mlp_pallas(x, params, H, W):
    """x: (B, N, C_in) with N == H*W. Returns (B, N, C_out)."""
    B, N, C_in = x.shape
    assert N == H * W
    hidden = params["w1"].shape[1]
    out_f = params["w2"].shape[1]

    Cp = _round_up(C_in, LANE)
    Hid = _round_up(hidden, LANE)
    Op = _round_up(out_f, LANE)

    f32 = jnp.float32
    # Zero-pad weights ONCE so every MXU / lane dimension is a multiple of 128.
    w1 = jnp.zeros((Cp, Hid), f32).at[:C_in, :hidden].set(params["w1"])
    b1 = jnp.zeros((1, Hid), f32).at[0, :hidden].set(params["b1"])
    wd = jnp.zeros((3, 3, Hid), f32).at[:, :, :hidden].set(params["wd"])
    bd = jnp.zeros((1, Hid), f32).at[0, :hidden].set(params["bd"])
    w2 = jnp.zeros((Hid, Op), f32).at[:hidden, :out_f].set(params["w2"])
    b2 = jnp.zeros((1, Op), f32).at[0, :out_f].set(params["b2"])
    xp = jnp.zeros((B, N, Cp), x.dtype).at[:, :, :C_in].set(x)

    # Per-token validity of each of the 9 conv taps (zero padding at the image
    # border), precomputed on host so the kernel needs no vector int div/mod.
    tok = np.arange(N)
    row, col = tok // W, tok % W
    masks = np.zeros((N, 16), np.float32)        # 9 used columns, padded to 16
    for ki in range(3):
        for kj in range(3):
            di, dj = ki - 1, kj - 1
            ok = ((row + di >= 0) & (row + di < H)
                  & (col + dj >= 0) & (col + dj < W))
            masks[:, ki * 3 + kj] = ok
    masks = jnp.asarray(masks)

    kernel = functools.partial(_mlp_fused_kernel, H=H, W=W)
    out = pl.pallas_call(
        kernel,
        out_shape=jax.ShapeDtypeStruct((B, N, Op), x.dtype),
        grid=(B,),
        in_specs=[
            pl.BlockSpec((None, N, Cp), lambda b: (b, 0, 0)),   # x: one image
            pl.BlockSpec((N, 16), lambda b: (0, 0)),            # tap masks
            pl.BlockSpec((Cp, Hid), lambda b: (0, 0)),          # w1 (resident)
            pl.BlockSpec((1, Hid), lambda b: (0, 0)),           # b1
            pl.BlockSpec((3, 3, Hid), lambda b: (0, 0, 0)),     # wd
            pl.BlockSpec((1, Hid), lambda b: (0, 0)),           # bd
            pl.BlockSpec((Hid, Op), lambda b: (0, 0)),          # w2
            pl.BlockSpec((1, Op), lambda b: (0, 0)),            # b2
        ],
        out_specs=pl.BlockSpec((None, N, Op), lambda b: (b, 0, 0)),
        compiler_params=pltpu.CompilerParams(
            dimension_semantics=("parallel",),
            vmem_limit_bytes=32 * 1024 * 1024,
        ),
    )(xp, masks, w1, b1, wd, bd, w2, b2)

    return out[:, :, :out_f]


# ------------------------------ pure-JAX reference ---------------------------

def mlp_reference(x, params, H, W):
    B, N, C_in = x.shape
    hidden = params["w1"].shape[1]
    h = x.reshape(B * N, C_in) @ params["w1"] + params["b1"]
    h = h.reshape(B, H, W, hidden)
    hp = jnp.pad(h, ((0, 0), (1, 1), (1, 1), (0, 0)))
    acc = jnp.zeros_like(h)
    for ki in range(3):
        for kj in range(3):
            acc = acc + hp[:, ki:ki + H, kj:kj + W, :] * params["wd"][ki, kj, :]
    acc = acc + params["bd"]
    acc = jax.nn.gelu(acc, approximate=False)
    out = acc.reshape(B * N, hidden) @ params["w2"] + params["b2"]
    return out.reshape(B, N, -1)


# ----------------------------------- main ------------------------------------

if __name__ == "__main__":
    key = jax.random.PRNGKey(0)
    B, H, W = 2, 8, 8
    N = H * W
    in_features = 32
    hidden_features = 64
    out_features = in_features  # out_features or in_features

    k = jax.random.split(key, 6)
    params = {
        # fc1: torch weight (hidden, in) -> stored transposed (in, hidden)
        "w1": jax.random.normal(k[0], (in_features, hidden_features), jnp.float32) * 0.05,
        "b1": jax.random.normal(k[1], (hidden_features,), jnp.float32) * 0.02,
        # depthwise conv: torch (hidden, 1, 3, 3) -> stored (3, 3, hidden)
        "wd": jax.random.normal(k[2], (3, 3, hidden_features), jnp.float32) * 0.1,
        "bd": jax.random.normal(k[3], (hidden_features,), jnp.float32) * 0.02,
        # fc2: torch weight (out, hidden) -> stored transposed (hidden, out)
        "w2": jax.random.normal(k[4], (hidden_features, out_features), jnp.float32) * 0.05,
        "b2": jax.random.normal(k[5], (out_features,), jnp.float32) * 0.02,
    }

    x = jax.random.normal(jax.random.PRNGKey(42), (B, N, in_features), jnp.float32)

    out = mlp_pallas(x, params, H, W)
    out = jax.block_until_ready(out)

    ref = mlp_reference(x, params, H, W)
    np.testing.assert_allclose(np.asarray(out), np.asarray(ref), rtol=2e-5, atol=2e-5)

    print("KERNEL_OK")
</pallas_src>

<mosaic_0001>
module attributes {stable_mosaic.version = 11 : i64} {
  func.func @_mlp_fused_kernel(%arg0: i32, %arg1: memref<1x64x128xf32, #tpu.memory_space<vmem>>, %arg2: memref<64x16xf32, #tpu.memory_space<vmem>>, %arg3: memref<128x128xf32, #tpu.memory_space<vmem>>, %arg4: memref<1x128xf32, #tpu.memory_space<vmem>>, %arg5: memref<3x3x128xf32, #tpu.memory_space<vmem>>, %arg6: memref<1x128xf32, #tpu.memory_space<vmem>>, %arg7: memref<128x128xf32, #tpu.memory_space<vmem>>, %arg8: memref<1x128xf32, #tpu.memory_space<vmem>>, %arg9: memref<1x64x128xf32, #tpu.memory_space<vmem>>) attributes {dimension_semantics = [#tpu.dimension_semantics<parallel>], iteration_bounds = array<i64: 2>, scalar_prefetch = 0 : i64, scratch_operands = 0 : i64, tpu.core_type = #tpu.core_type<tc>, window_params = [{transform_indices = @transform_0, window_bounds = array<i64: 1, 64, 128>}, {pipeline_mode = #tpu.pipeline_mode<synchronous>, transform_indices = @transform_1, window_bounds = array<i64: 64, 16>}, {pipeline_mode = #tpu.pipeline_mode<synchronous>, transform_indices = @transform_2, window_bounds = array<i64: 128, 128>}, {pipeline_mode = #tpu.pipeline_mode<synchronous>, transform_indices = @transform_3, window_bounds = array<i64: 1, 128>}, {pipeline_mode = #tpu.pipeline_mode<synchronous>, transform_indices = @transform_4, window_bounds = array<i64: 3, 3, 128>}, {pipeline_mode = #tpu.pipeline_mode<synchronous>, transform_indices = @transform_5, window_bounds = array<i64: 1, 128>}, {pipeline_mode = #tpu.pipeline_mode<synchronous>, transform_indices = @transform_6, window_bounds = array<i64: 128, 128>}, {pipeline_mode = #tpu.pipeline_mode<synchronous>, transform_indices = @transform_7, window_bounds = array<i64: 1, 128>}, {transform_indices = @transform_8, window_bounds = array<i64: 1, 64, 128>}]} {
    %c0 = arith.constant 0 : index
    %c0_0 = arith.constant 0 : index
    %c0_1 = arith.constant 0 : index
    %0 = vector.load %arg1[%c0, %c0_0, %c0_1] : memref<1x64x128xf32, #tpu.memory_space<vmem>>, vector<1x64x128xf32>
    %1 = vector.shape_cast %0 : vector<1x64x128xf32> to vector<64x128xf32>
    %c0_2 = arith.constant 0 : index
    %c0_3 = arith.constant 0 : index
    %2 = vector.load %arg3[%c0_2, %c0_3] : memref<128x128xf32, #tpu.memory_space<vmem>>, vector<128x128xf32>
    %cst = arith.constant dense<0.000000e+00> : vector<64x128xf32>
    %3 = tpu.matmul %1, %2, %cst {dimension_numbers = #tpu.dot_dimension_numbers<[1], [0], [0], [1], [0, 0, 1, 1], [], []>} : vector<64x128xf32>, vector<128x128xf32>, vector<64x128xf32> -> vector<64x128xf32>
    %c0_4 = arith.constant 0 : index
    %c0_5 = arith.constant 0 : index
    %4 = vector.load %arg4[%c0_4, %c0_5] : memref<1x128xf32, #tpu.memory_space<vmem>>, vector<1x128xf32>
    %5 = vector.broadcast %4 : vector<1x128xf32> to vector<64x128xf32>
    %6 = arith.addf %3, %5 : vector<64x128xf32>
    %c0_6 = arith.constant 0 : index
    %c0_7 = arith.constant 0 : index
    %c0_8 = arith.constant 0 : index
    %7 = vector.load %arg5[%c0_6, %c0_7, %c0_8] : memref<3x3x128xf32, #tpu.memory_space<vmem>>, vector<3x3x128xf32>
    %8 = vector.extract_strided_slice %7 {offsets = [1, 1, 0], sizes = [1, 1, 128], strides = [1, 1, 1]} : vector<3x3x128xf32> to vector<1x1x128xf32>
    %9 = vector.shape_cast %8 : vector<1x1x128xf32> to vector<128xf32>
    %10 = vector.shape_cast %9 : vector<128xf32> to vector<1x128xf32>
    %11 = vector.broadcast %10 : vector<1x128xf32> to vector<64x128xf32>
    %12 = arith.mulf %6, %11 : vector<64x128xf32>
    %c9_i32 = arith.constant 9 : i32
    %13 = tpu.dynamic_rotate %6 by %c9_i32 dim 0 : vector<64x128xf32>, i32 -> vector<64x128xf32>
    %c0_9 = arith.constant 0 : index
    %c0_10 = arith.constant 0 : index
    %14 = vector.load %arg2[%c0_9, %c0_10] : memref<64x16xf32, #tpu.memory_space<vmem>>, vector<64x1xf32>
    %15 = vector.broadcast %14 : vector<64x1xf32> to vector<64x128xf32>
    %16 = arith.mulf %13, %15 : vector<64x128xf32>
    %17 = vector.extract_strided_slice %7 {offsets = [0, 0, 0], sizes = [1, 1, 128], strides = [1, 1, 1]} : vector<3x3x128xf32> to vector<1x1x128xf32>
    %18 = vector.shape_cast %17 : vector<1x1x128xf32> to vector<128xf32>
    %19 = vector.shape_cast %18 : vector<128xf32> to vector<1x128xf32>
    %20 = vector.broadcast %19 : vector<1x128xf32> to vector<64x128xf32>
    %21 = arith.mulf %16, %20 : vector<64x128xf32>
    %22 = arith.addf %12, %21 : vector<64x128xf32>
    %c8_i32 = arith.constant 8 : i32
    %23 = tpu.dynamic_rotate %6 by %c8_i32 dim 0 : vector<64x128xf32>, i32 -> vector<64x128xf32>
    %c0_11 = arith.constant 0 : index
    %c1 = arith.constant 1 : index
    %24 = vector.load %arg2[%c0_11, %c1] : memref<64x16xf32, #tpu.memory_space<vmem>>, vector<64x1xf32>
    %25 = vector.broadcast %24 : vector<64x1xf32> to vector<64x128xf32>
    %26 = arith.mulf %23, %25 : vector<64x128xf32>
    %27 = vector.extract_strided_slice %7 {offsets = [0, 1, 0], sizes = [1, 1, 128], strides = [1, 1, 1]} : vector<3x3x128xf32> to vector<1x1x128xf32>
    %28 = vector.shape_cast %27 : vector<1x1x128xf32> to vector<128xf32>
    %29 = vector.shape_cast %28 : vector<128xf32> to vector<1x128xf32>
    %30 = vector.broadcast %29 : vector<1x128xf32> to vector<64x128xf32>
    %31 = arith.mulf %26, %30 : vector<64x128xf32>
    %32 = arith.addf %22, %31 : vector<64x128xf32>
    %c7_i32 = arith.constant 7 : i32
    %33 = tpu.dynamic_rotate %6 by %c7_i32 dim 0 : vector<64x128xf32>, i32 -> vector<64x128xf32>
    %c0_12 = arith.constant 0 : index
    %c2 = arith.constant 2 : index
    %34 = vector.load %arg2[%c0_12, %c2] : memref<64x16xf32, #tpu.memory_space<vmem>>, vector<64x1xf32>
    %35 = vector.broadcast %34 : vector<64x1xf32> to vector<64x128xf32>
    %36 = arith.mulf %33, %35 : vector<64x128xf32>
    %37 = vector.extract_strided_slice %7 {offsets = [0, 2, 0], sizes = [1, 1, 128], strides = [1, 1, 1]} : vector<3x3x128xf32> to vector<1x1x128xf32>
    %38 = vector.shape_cast %37 : vector<1x1x128xf32> to vector<128xf32>
    %39 = vector.shape_cast %38 : vector<128xf32> to vector<1x128xf32>
    %40 = vector.broadcast %39 : vector<1x128xf32> to vector<64x128xf32>
    %41 = arith.mulf %36, %40 : vector<64x128xf32>
    %42 = arith.addf %32, %41 : vector<64x128xf32>
    %c1_i32 = arith.constant 1 : i32
    %43 = tpu.dynamic_rotate %6 by %c1_i32 dim 0 : vector<64x128xf32>, i32 -> vector<64x128xf32>
    %c0_13 = arith.constant 0 : index
    %c3 = arith.constant 3 : index
    %44 = vector.load %arg2[%c0_13, %c3] : memref<64x16xf32, #tpu.memory_space<vmem>>, vector<64x1xf32>
    %45 = vector.broadcast %44 : vector<64x1xf32> to vector<64x128xf32>
    %46 = arith.mulf %43, %45 : vector<64x128xf32>
    %47 = vector.extract_strided_slice %7 {offsets = [1, 0, 0], sizes = [1, 1, 128], strides = [1, 1, 1]} : vector<3x3x128xf32> to vector<1x1x128xf32>
    %48 = vector.shape_cast %47 : vector<1x1x128xf32> to vector<128xf32>
    %49 = vector.shape_cast %48 : vector<128xf32> to vector<1x128xf32>
    %50 = vector.broadcast %49 : vector<1x128xf32> to vector<64x128xf32>
    %51 = arith.mulf %46, %50 : vector<64x128xf32>
    %52 = arith.addf %42, %51 : vector<64x128xf32>
    %c63_i32 = arith.constant 63 : i32
    %53 = tpu.dynamic_rotate %6 by %c63_i32 dim 0 : vector<64x128xf32>, i32 -> vector<64x128xf32>
    %c0_14 = arith.constant 0 : index
    %c5 = arith.constant 5 : index
    %54 = vector.load %arg2[%c0_14, %c5] : memref<64x16xf32, #tpu.memory_space<vmem>>, vector<64x1xf32>
    %55 = vector.broadcast %54 : vector<64x1xf32> to vector<64x128xf32>
    %56 = arith.mulf %53, %55 : vector<64x128xf32>
    %57 = vector.extract_strided_slice %7 {offsets = [1, 2, 0], sizes = [1, 1, 128], strides = [1, 1, 1]} : vector<3x3x128xf32> to vector<1x1x128xf32>
    %58 = vector.shape_cast %57 : vector<1x1x128xf32> to vector<128xf32>
    %59 = vector.shape_cast %58 : vector<128xf32> to vector<1x128xf32>
    %60 = vector.broadcast %59 : vector<1x128xf32> to vector<64x128xf32>
    %61 = arith.mulf %56, %60 : vector<64x128xf32>
    %62 = arith.addf %52, %61 : vector<64x128xf32>
    %c57_i32 = arith.constant 57 : i32
    %63 = tpu.dynamic_rotate %6 by %c57_i32 dim 0 : vector<64x128xf32>, i32 -> vector<64x128xf32>
    %c0_15 = arith.constant 0 : index
    %c6 = arith.constant 6 : index
    %64 = vector.load %arg2[%c0_15, %c6] : memref<64x16xf32, #tpu.memory_space<vmem>>, vector<64x1xf32>
    %65 = vector.broadcast %64 : vector<64x1xf32> to vector<64x128xf32>
    %66 = arith.mulf %63, %65 : vector<64x128xf32>
    %67 = vector.extract_strided_slice %7 {offsets = [2, 0, 0], sizes = [1, 1, 128], strides = [1, 1, 1]} : vector<3x3x128xf32> to vector<1x1x128xf32>
    %68 = vector.shape_cast %67 : vector<1x1x128xf32> to vector<128xf32>
    %69 = vector.shape_cast %68 : vector<128xf32> to vector<1x128xf32>
    %70 = vector.broadcast %69 : vector<1x128xf32> to vector<64x128xf32>
    %71 = arith.mulf %66, %70 : vector<64x128xf32>
    %72 = arith.addf %62, %71 : vector<64x128xf32>
    %c56_i32 = arith.constant 56 : i32
    %73 = tpu.dynamic_rotate %6 by %c56_i32 dim 0 : vector<64x128xf32>, i32 -> vector<64x128xf32>
    %c0_16 = arith.constant 0 : index
    %c7 = arith.constant 7 : index
    %74 = vector.load %arg2[%c0_16, %c7] : memref<64x16xf32, #tpu.memory_space<vmem>>, vector<64x1xf32>
    %75 = vector.broadcast %74 : vector<64x1xf32> to vector<64x128xf32>
    %76 = arith.mulf %73, %75 : vector<64x128xf32>
    %77 = vector.extract_strided_slice %7 {offsets = [2, 1, 0], sizes = [1, 1, 128], strides = [1, 1, 1]} : vector<3x3x128xf32> to vector<1x1x128xf32>
    %78 = vector.shape_cast %77 : vector<1x1x128xf32> to vector<128xf32>
    %79 = vector.shape_cast %78 : vector<128xf32> to vector<1x128xf32>
    %80 = vector.broadcast %79 : vector<1x128xf32> to vector<64x128xf32>
    %81 = arith.mulf %76, %80 : vector<64x128xf32>
    %82 = arith.addf %72, %81 : vector<64x128xf32>
    %c55_i32 = arith.constant 55 : i32
    %83 = tpu.dynamic_rotate %6 by %c55_i32 dim 0 : vector<64x128xf32>, i32 -> vector<64x128xf32>
    %c0_17 = arith.constant 0 : index
    %c8 = arith.constant 8 : index
    %84 = vector.load %arg2[%c0_17, %c8] : memref<64x16xf32, #tpu.memory_space<vmem>>, vector<64x1xf32>
    %85 = vector.broadcast %84 : vector<64x1xf32> to vector<64x128xf32>
    %86 = arith.mulf %83, %85 : vector<64x128xf32>
    %87 = vector.extract_strided_slice %7 {offsets = [2, 2, 0], sizes = [1, 1, 128], strides = [1, 1, 1]} : vector<3x3x128xf32> to vector<1x1x128xf32>
    %88 = vector.shape_cast %87 : vector<1x1x128xf32> to vector<128xf32>
    %89 = vector.shape_cast %88 : vector<128xf32> to vector<1x128xf32>
    %90 = vector.broadcast %89 : vector<1x128xf32> to vector<64x128xf32>
    %91 = arith.mulf %86, %90 : vector<64x128xf32>
    %92 = arith.addf %82, %91 : vector<64x128xf32>
    %c0_18 = arith.constant 0 : index
    %c0_19 = arith.constant 0 : index
    %93 = vector.load %arg6[%c0_18, %c0_19] : memref<1x128xf32, #tpu.memory_space<vmem>>, vector<1x128xf32>
    %94 = vector.broadcast %93 : vector<1x128xf32> to vector<64x128xf32>
    %95 = arith.addf %92, %94 : vector<64x128xf32>
    %cst_20 = arith.constant 5.000000e-01 : f32
    %96 = vector.broadcast %cst_20 : f32 to vector<64x128xf32>
    %97 = arith.mulf %96, %95 : vector<64x128xf32>
    %cst_21 = arith.constant 0.707106769 : f32
    %98 = vector.broadcast %cst_21 : f32 to vector<64x128xf32>
    %99 = arith.mulf %95, %98 : vector<64x128xf32>
    %100 = math.erf %99 : vector<64x128xf32>
    %cst_22 = arith.constant 1.000000e+00 : f32
    %101 = vector.broadcast %cst_22 : f32 to vector<64x128xf32>
    %102 = arith.addf %101, %100 : vector<64x128xf32>
    %103 = arith.mulf %97, %102 : vector<64x128xf32>
    %c0_23 = arith.constant 0 : index
    %c0_24 = arith.constant 0 : index
    %104 = vector.load %arg7[%c0_23, %c0_24] : memref<128x128xf32, #tpu.memory_space<vmem>>, vector<128x128xf32>
    %cst_25 = arith.constant dense<0.000000e+00> : vector<64x128xf32>
    %105 = tpu.matmul %103, %104, %cst_25 {dimension_numbers = #tpu.dot_dimension_numbers<[1], [0], [0], [1], [0, 0, 1, 1], [], []>} : vector<64x128xf32>, vector<128x128xf32>, vector<64x128xf32> -> vector<64x128xf32>
    %c0_26 = arith.constant 0 : index
    %c0_27 = arith.constant 0 : index
    %106 = vector.load %arg8[%c0_26, %c0_27] : memref<1x128xf32, #tpu.memory_space<vmem>>, vector<1x128xf32>
    %107 = vector.broadcast %106 : vector<1x128xf32> to vector<64x128xf32>
    %108 = arith.addf %105, %107 : vector<64x128xf32>
    %c0_28 = arith.constant 0 : index
    %c0_29 = arith.constant 0 : index
    %c0_30 = arith.constant 0 : index
    %109 = vector.load %arg9[%c0_28, %c0_29, %c0_30] : memref<1x64x128xf32, #tpu.memory_space<vmem>>, vector<1x64x128xf32>
    %110 = vector.shape_cast %109 : vector<1x64x128xf32> to vector<64x128xf32>
    %111 = vector.shape_cast %108 : vector<64x128xf32> to vector<1x64x128xf32>
    tpu.vector_store %arg9[%c0_28, %c0_29, %c0_30], %111 {strides = array<i32>} : memref<1x64x128xf32, #tpu.memory_space<vmem>>, vector<1x64x128xf32>,
    return
  }
  func.func @transform_0(%arg0: i32) -> (i32, i32, i32) {
    %c0_i32 = arith.constant 0 : i32
    %c0_i32_0 = arith.constant 0 : i32
    %c0_i32_1 = arith.constant 0 : i32
    return %arg0, %c0_i32, %c0_i32_0 : i32, i32, i32
  }
  func.func @transform_1(%arg0: i32) -> (i32, i32) {
    %c0_i32 = arith.constant 0 : i32
    %c0_i32_0 = arith.constant 0 : i32
    %c0_i32_1 = arith.constant 0 : i32
    return %c0_i32, %c0_i32_0 : i32, i32
  }
  func.func @transform_2(%arg0: i32) -> (i32, i32) {
    %c0_i32 = arith.constant 0 : i32
    %c0_i32_0 = arith.constant 0 : i32
    %c0_i32_1 = arith.constant 0 : i32
    return %c0_i32, %c0_i32_0 : i32, i32
  }
  func.func @transform_3(%arg0: i32) -> (i32, i32) {
    %c0_i32 = arith.constant 0 : i32
    %c0_i32_0 = arith.constant 0 : i32
    %c0_i32_1 = arith.constant 0 : i32
    return %c0_i32, %c0_i32_0 : i32, i32
  }
  func.func @transform_4(%arg0: i32) -> (i32, i32, i32) {
    %c0_i32 = arith.constant 0 : i32
    %c0_i32_0 = arith.constant 0 : i32
    %c0_i32_1 = arith.constant 0 : i32
    %c0_i32_2 = arith.constant 0 : i32
    return %c0_i32, %c0_i32_0, %c0_i32_1 : i32, i32, i32
  }
  func.func @transform_5(%arg0: i32) -> (i32, i32) {
    %c0_i32 = arith.constant 0 : i32
    %c0_i32_0 = arith.constant 0 : i32
    %c0_i32_1 = arith.constant 0 : i32
    return %c0_i32, %c0_i32_0 : i32, i32
  }
  func.func @transform_6(%arg0: i32) -> (i32, i32) {
    %c0_i32 = arith.constant 0 : i32
    %c0_i32_0 = arith.constant 0 : i32
    %c0_i32_1 = arith.constant 0 : i32
    return %c0_i32, %c0_i32_0 : i32, i32
  }
  func.func @transform_7(%arg0: i32) -> (i32, i32) {
    %c0_i32 = arith.constant 0 : i32
    %c0_i32_0 = arith.constant 0 : i32
    %c0_i32_1 = arith.constant 0 : i32
    return %c0_i32, %c0_i32_0 : i32, i32
  }
  func.func @transform_8(%arg0: i32) -> (i32, i32, i32) {
    %c0_i32 = arith.constant 0 : i32
    %c0_i32_0 = arith.constant 0 : i32
    %c0_i32_1 = arith.constant 0 : i32
    return %arg0, %c0_i32, %c0_i32_0 : i32, i32, i32
  }
}

</mosaic_0001>

<bundles_post_ra>
// kernel: tpu_custom_call.1
= control target key start
LH: loop header
LB: loop body
LE: loop exit
PB: predicated region body
PF: predicated region fallthrough
CT: control target
= control target key end

     0   :  { %s2891_s0 = inlined_call_operand.hbm [shape: f32[2,64,128], index: 0, kind: input, shape index: {}]   ;;  %s2892_s1 = inlined_call_operand.vmem [shape: f32[64,16], index: 1, kind: input, shape index: {}]   ;;  %s2893_s2 = inlined_call_operand.hbm [shape: f32[128,128], index: 2, kind: input, shape index: {}]   ;;  %s2894_s3 = inlined_call_operand.vmem [shape: f32[1,128], index: 3, kind: input, shape index: {}]   ;;  %s2895_s4 = inlined_call_operand.vmem [shape: f32[3,3,128], index: 4, kind: input, shape index: {}]   ;;  %s2896_s5 = inlined_call_operand.vmem [shape: f32[1,128], index: 5, kind: input, shape index: {}]   ;;  %s2897_s6 = inlined_call_operand.hbm [shape: f32[128,128], index: 6, kind: input, shape index: {}]   ;;  %s2898_s7 = inlined_call_operand.vmem [shape: f32[1,128], index: 7, kind: input, shape index: {}]   ;;  %s2899_s8 = inlined_call_operand.hbm [shape: f32[2,64,128], index: 8, kind: output, shape index: {}]  }
   0x1   :  { %2916 = sst [smem:[#allocation22_spill]] %s2893_s2 }
   0x2   :  { %2917 = sst [smem:[#allocation23_spill]] %s2897_s6 }
   0x3   :  { %13 = vsyncpa [#allocation3], 0 }
   0x4   :  { %15 = vsyncpa [#allocation3 + $0x1], 0 }
   0x5   :  { %16 = vsyncpa [#allocation6], 0 }
   0x6   :  { %17 = vsyncpa [#allocation4], 0 }
   0x7   :  { %19 = vsyncpa [#allocation4 + $0x1], 0  ;;  %s1911_s27 = smov 0   ;;  %s1913_s28 = smov 0  }
   0x8   :  { %s1915_s29 = smov 0   ;;  %s1917_s30 = smov 0  }
   0x9 LB: > { %s1932_s9 = sadd.s32 4294967295, %s1850_s30   ;;  %s1489_s10 = sadd.s32 4294967294, %s1850_s30   ;;  %s1850_s30 = sphi %s1917_s30, %s2965_s30   ;;  %s1846_s29 = sphi %s1915_s29, %s2964_s29   ;;  %s1842_s28 = sphi %s1913_s28, %s2963_s28   ;;  %s1838_s27 = sphi %s1911_s27, %s2962_s27  }
   0xa   : > { %p45_p0 = scmp.ne.s32.totalorder %s1842_s28, %s1838_s27  ;;  %p46_p1 = scmp.eq.s32.totalorder %s1932_s9, 0 }
   0xb   : > { %p216_p2 = scmp.eq.s32.totalorder %s1932_s9, 1  ;;  %p222_p3 = scmp.eq.s32.totalorder %s1489_s10, 1 }
   0xc   : > { %p1941_p4 = por %p46_p1, %p45_p0  ;;  %p1490_p5 = scmp.ge.s32.totalorder %s1850_s30, 1 }
   0xd   : > { %p1946_p6 = por %p222_p3, %p45_p0  ;;  %p229_p7 = scmp.lt.s32.totalorder %s1850_s30, 3 }
   0xe   : > { %s2920_s2 = sld [smem:[#allocation22_spill]]  ;;  %s1852_s17 = smov [#allocation5]  }
   0xf   : > { %p1954_p8 = pnand %p1490_p5, %p229_p7  ;;  %s245_s18 = sshll.u32 %s1852_s17, 4  ;;  %s246_s18 = int_to_ptr.vmem [resolvable:$true] %s245_s18 }
  0x10   : > { %s2922_s6 = sld [smem:[#allocation23_spill]]  ;;  %s2900_s22 = smov 128  }
  0x11   : > { %p1561_p9 = pneg %p1954_p8  ;;  %s2901_s23 = smov 8  }
  0x12   : > { %s1855_s24 = smov [#allocation7]   ;;  %s1973_s26 = sadd.s32 1, %s1850_s30  }
  0x13   : > { %p1562_p10 = pnand %p1561_p9, %p46_p1  ;;  %s268_s25 = sshll.u32 %s1855_s24, 4  ;;  %s269_s25 = int_to_ptr.vmem [resolvable:$true] %s268_s25 }
  0x14   : > { %s243_s15 = sshll.u32 %s2920_s2, 4  ;;  %s32_s10 = sadd.s32 1, %s1846_s29  ;;  %s244_s15 = int_to_ptr.hbm [resolvable:$true] %s243_s15 }
  0x15   : > { %1564 = dma.hbm_to_vmem [thread:$0]  (!%p1562_p10), %s244_s15, 2048, %s246_s18, [#allocation6], %s2900_s22, %s2900_s22, %s2901_s23  }
  0x16   : > { %s266_s21 = sshll.u32 %s2922_s6, 4  ;;  %s29_s13 = ssub.s32 %s1850_s30, %s1973_s26  ;;  %s267_s21 = int_to_ptr.hbm [resolvable:$true] %s266_s21 }
  0x17   : > { %1567 = dma.hbm_to_vmem [thread:$0]  (!%p1562_p10), %s267_s21, 2048, %s269_s25, [#allocation6], %s2900_s22, %s2900_s22, %s2901_s23  }
  0x18   : > { %p39_p12 = scmp.ne.s32.totalorder %s1846_s29, %s1842_s28  ;;  %p30_p13 = scmp.eq.s32.totalorder %s29_s13, 0 }
  0x19   : > { %p40_p0 = scmp.eq.s32.totalorder %s1850_s30, 0  ;;  %p1578_p5 = scmp.lt.s32.totalorder %s1850_s30, 2 }
  0x1a   : > { %p1983_p3 = por %p216_p2, %p39_p12  ;;  %s285_s17 = sand.u32 1, %s1846_s29  }
  0x1b   : > { %s1989_s15 = scalar_select %p30_p13, %s1846_s29, %s32_s10  }
  0x1c   : > { %p41_p7 = por %p40_p0, %p39_p12  ;;  %s1494_s18 = sshll.u32 %s285_s17, 6 }
  0x1d   : > { %s1515_s19 = sshll.u32 %s1850_s30, 6  ;;  %s289_s25 = scalar_lea.vmem [#allocation2], %s1494_s18 }
  0x1e   : > { %s294_s24 = scalar_lea.hbm %s2891_s0, %s1515_s19  ;;  %s297_s22 = sshll.u32 %s289_s25, 4  ;;  %s298_s22 = int_to_ptr.vmem [resolvable:$true] %s297_s22 }
  0x1f   : > { %s295_s13 = sshll.u32 %s294_s24, 4  ;;  %p1996_p2 = pnand %p1578_p5, %p41_p7  ;;  %s296_s13 = int_to_ptr.hbm [resolvable:$true] %s295_s13 }
  0x20   : > { %s286_s10 = scalar_lea.sflag [#allocation3], %s285_s17  ;;  %s1750_s2 = sshra.s32 %s296_s13, 4  ;;  %s1751_s2 = int_to_ptr.hbm [resolvable:$true] %s1750_s2 }
  0x21   : > { %s1752_s6 = scalar_lea.hbm %s1751_s2, 64  ;;  %p1754_p10 = pneg %p1996_p2 }
  0x22   : > { %p1753_p9 = scmp.ne.s32.totalorder %s1751_s2, %s1752_s6  ;;  %s1757_s20 = scalar_lea.hbm %s2891_s0, 128 }
  0x23   : > { %p1758_p0 = scmp.lt.s32.totalorder %s1751_s2, %s2891_s0  ;;  %p1759_p5 = scmp.lt.s32.totalorder %s1757_s20, %s1752_s6 }
  0x24   : > { %p1755_p12 = pnand %p1754_p10, %p1753_p9 }
  0x25   : > { %p1760_p7 = por %p1759_p5, %p1758_p0 }
  0x26   : > { %p1756_p13 = pneg %p1755_p12 }
  0x28   : > { %p1761_p11 = pnand %p1760_p7, %p1756_p13 }
  0x2a   : > { %1764 = shalt.err (!%p1761_p11)
}
  0x2b   : > { %s2925_s17 = smov 8   ;;  %s2926_s25 = smov 128  }
  0x2c   : > { %1571 = dma.hbm_to_vmem [thread:$0]  (!%p1996_p2), %s296_s13, 1024, %s298_s22, %s286_s10, %s2926_s25, %s2926_s25, %s2925_s17  }
  0x2d   : > { %309 = sbr.rel (%p1954_p8) target bundleno = 575 (0x23f), region = 52 }
  0x32   : > { %s2016_s19 = sand.u32 1, %s1842_s28  }
  0x33   : > { %s1498_s2 = sshll.u32 %s2016_s19, 6  ;;  %s312_s6 = scalar_lea.sflag [#allocation3], %s2016_s19 }
  0x34   : > { %s2022_s18 = scalar_lea.vmem [#allocation2], %s1498_s2 }
  0x35   : > { %1825 = dma.done.wait (%p1941_p4), %s312_s6, 1024  }
  0x36   : > { %1827 = vsyncadd (%p1941_p4), %s312_s6, 4294966272 }
  0x37   : > { %1829 = dma.done.wait (%p46_p1), [#allocation6], 4096  }
  0x38   : > { %1831 = vsyncadd (%p46_p1), [#allocation6], 4294963200  ;;  %v1856_v0 = vmov 0   ;;  %v2035_v1 = vld [vmem:[%s2892_s1 + $0x20] sm:$0xff]  ;;  %v2040_v2 = vld [vmem:[%s2892_s1 + $0x10] sm:$0xff]  ;;  %v1857_v18 = vmov 1   ;;  %v448_v62 = vlaneseq }
  0x39   : > { %1630 = vset.pattern.permute.xlu2 %v1856_v0  ;;  %1629 = vset.pattern.permute.xlu1 %v1856_v0  ;;  %v2045_v3 = vld [vmem:[%s2892_s1] sm:$0xff]  ;;  %v382_v4 = vld [vmem:[#allocation5 + $0x78] sm:$0xff]  ;;  %v381_v5 = vld [vmem:[#allocation5 + $0x70] sm:$0xff]  ;;  %v1858_v30 = vmov 2   ;;  %v1859_v33 = vmov 3   ;;  %v2906_v36 = vmov 8  }
  0x3a   : > { %1628 = vset.pattern.permute.xlu0 %v1856_v0  ;;  %489 = vperm.xlu2 %1630, %v2035_v1   ;;  %v380_v6 = vld [vmem:[#allocation5 + $0x68] sm:$0xff]  ;;  %v379_v7 = vld [vmem:[#allocation5 + $0x60] sm:$0xff]  ;;  %v2058_v9 = vld [vmem:[%s2892_s1 + $0x18] sm:$0xff]  ;;  %v2902_v37 = vmov 6   ;;  %v1862_v38 = vmov 7   ;;  %v2904_v39 = vmov 5  }
  0x3b   : > { %479 = vperm.xlu1 %1629, %v2040_v2   ;;  %469 = vperm.xlu0 %1628, %v2045_v3   ;;  %v2053_v8 = vld [vmem:[%s2892_s1 + $0x28] sm:$0xff]  ;;  %v378_v11 = vld [vmem:[#allocation5 + $0x58] sm:$0xff]  ;;  %v377_v12 = vld [vmem:[#allocation5 + $0x50] sm:$0xff]  ;;  %s358_s13 = scalar_lea.vmem [#allocation8], %s1498_s2  ;;  %s1382_s24 = scalar_lea.sflag [#allocation4], %s2016_s19 }
  0x3c   : > { %387 = vmatpush.msra.mxu0 %v382_v4  ;;  %1517 = vmatpush.msra.mxu2 %v382_v4  ;;  %v2063_v10 = vld [vmem:[%s2892_s1 + $0x8] sm:$0xff]  ;;  %v375_v14 = vld [vmem:[#allocation5 + $0x40] sm:$0xff]  ;;  %v2071_v15 = vld [vmem:[%s2892_s1 + $0x38] sm:$0xff]  ;;  %s1394_s20 = sshll.u32 %s358_s13, 4  ;;  %s1800_s16 = scalar_lea.hbm %s2899_s8, 128  ;;  %s1395_s20 = int_to_ptr.vmem [resolvable:$true] %s1394_s20 }
  0x3d   : > { %v376_v13 = vld [vmem:[#allocation5 + $0x48] sm:$0xff]  ;;  %v2076_v16 = vld [vmem:[%s2892_s1 + $0x30] sm:$0xff]  ;;  %v374_v17 = vld [vmem:[#allocation5 + $0x38] sm:$0xff] }
  0x3e   : > { %388 = vmatpush.msra.mxu0 %v381_v5  ;;  %1518 = vmatpush.msra.mxu2 %v381_v5  ;;  %v373_v19 = vld [vmem:[#allocation5 + $0x30] sm:$0xff]  ;;  %v372_v20 = vld [vmem:[#allocation5 + $0x28] sm:$0xff]  ;;  %v371_v21 = vld [vmem:[#allocation5 + $0x20] sm:$0xff] }
  0x3f   : > { %v370_v22 = vld [vmem:[#allocation5 + $0x18] sm:$0xff]  ;;  %v369_v23 = vld [vmem:[#allocation5 + $0x10] sm:$0xff]  ;;  %v368_v24 = vld [vmem:[#allocation5 + $0x8] sm:$0xff] }
  0x40   : > { %389 = vmatpush.msra.mxu0 %v380_v6  ;;  %1519 = vmatpush.msra.mxu2 %v380_v6  ;;  %v367_v25 = vld [vmem:[#allocation5] sm:$0xff]  ;;  %v360_v28 = vld [vmem:[%s2022_s18 + $0x8] sm:$0xff]  ;;  %v361_v31 = vld [vmem:[%s2022_s18 + $0x10] sm:$0xff] }
  0x41   : > { %v359_v26 = vld [vmem:[%s2022_s18] sm:$0xff]  ;;  %v364_v29 = vld [vmem:[%s2022_s18 + $0x28] sm:$0xff]  ;;  %v365_v32 = vld [vmem:[%s2022_s18 + $0x30] sm:$0xff] }
  0x42   : > { %390 = vmatpush.msra.mxu0 %v379_v7  ;;  %1520 = vmatpush.msra.mxu2 %v379_v7  ;;  %v363_v27 = vld [vmem:[%s2022_s18 + $0x20] sm:$0xff]  ;;  %v362_v34 = vld [vmem:[%s2022_s18 + $0x18] sm:$0xff] }
  0x43   : > { %494 = vperm.xlu2 %1630, %v2053_v8   ;;  %484 = vperm.xlu1 %1629, %v2058_v9   ;;  %v366_v35 = vld [vmem:[%s2022_s18 + $0x38] sm:$0xff]  ;;  %v2204_v63 = vld [vmem:[%s2894_s3] ss:$0 sm:$0xff]  ;;  %s1516_s18 = sshll.u32 %s1932_s9, 6 }
  0x44   : > { %474 = vperm.xlu0 %1628, %v2063_v10   ;;  %391 = vmatpush.msra.mxu0 %v378_v11  ;;  %s1393_s10 = scalar_lea.hbm %s2899_s8, %s1516_s18 }
  0x45   : > { %1521 = vmatpush.msra.mxu2 %v378_v11  ;;  %s1396_s21 = sshll.u32 %s1393_s10, 4  ;;  %s1397_s21 = int_to_ptr.hbm [resolvable:$true] %s1396_s21 }
  0x46   : > { %392 = vmatpush.msra.mxu0 %v377_v12  ;;  %s1794_s17 = sshra.s32 %s1397_s21, 4  ;;  %s1795_s17 = int_to_ptr.hbm [resolvable:$true] %s1794_s17 }
  0x47   : > { %1522 = vmatpush.msra.mxu2 %v377_v12  ;;  %s1796_s25 = scalar_lea.hbm %s1795_s17, 64  ;;  %p1801_p11 = scmp.lt.s32.totalorder %s1795_s17, %s2899_s8 }
  0x48   : > { %393 = vmatpush.msra.mxu0 %v376_v13  ;;  %p1797_p1 = scmp.ne.s32.totalorder %s1795_s17, %s1796_s25  ;;  %p1802_p2 = scmp.lt.s32.totalorder %s1800_s16, %s1796_s25 }
  0x49   : > { %1523 = vmatpush.msra.mxu2 %v376_v13  ;;  %v2231_v13 = vld [vmem:[%s2895_s4 + $0x4] sm:$0x7] }
  0x4a   : > { %394 = vmatpush.msra.mxu0 %v375_v14  ;;  %p1798_p4 = pnand %p1797_p1, %p1983_p3  ;;  %p1803_p9 = por %p1802_p2, %p1801_p11 }
  0x4b   : > { %1524 = vmatpush.msra.mxu2 %v375_v14  ;;  %1631 = vset.pattern.permute.xlu2 %v1857_v18 }
  0x4c   : > { %504 = vperm.xlu1 %1629, %v2071_v15   ;;  %499 = vperm.xlu0 %1628, %v2076_v16   ;;  %p1799_p8 = pneg %p1798_p4 }
  0x4d   : > { %395 = vmatpush.msra.mxu0 %v374_v17  ;;  %1525 = vmatpush.msra.mxu2 %v374_v17 }
  0x4e   : > { %533 = vperm.xlu2 %1631, %v2045_v3   ;;  %p1804_p10 = pnand %p1803_p9, %p1799_p8 }
  0x4f   : > { %396 = vmatpush.msra.mxu0 %v373_v19  ;;  %1526 = vmatpush.msra.mxu2 %v373_v19 }
  0x51   : > { %397 = vmatpush.msra.mxu0 %v372_v20  ;;  %1527 = vmatpush.msra.mxu2 %v372_v20 }
  0x53   : > { %398 = vmatpush.msra.mxu0 %v371_v21  ;;  %1528 = vmatpush.msra.mxu2 %v371_v21 }
  0x54   : > { %1633 = vset.pattern.permute.xlu1 %v1857_v18  ;;  %1632 = vset.pattern.permute.xlu0 %v1857_v18 }
  0x55   : > { %399 = vmatpush.msra.mxu0 %v370_v22  ;;  %1529 = vmatpush.msra.mxu2 %v370_v22 }
  0x56   : > { %541 = vperm.xlu1 %1633, %v2040_v2   ;;  %545 = vperm.xlu2 %1631, %v2058_v9  }
  0x57   : > { %537 = vperm.xlu0 %1632, %v2063_v10   ;;  %400 = vmatpush.msra.mxu0 %v369_v23 }
  0x58   : > { %1530 = vmatpush.msra.mxu2 %v369_v23  ;;  %v2251_v23 = vperm.slane %v2231_v13, 1 }
  0x59   : > { %401 = vmatpush.msra.mxu0 %v368_v24 }
  0x5a   : > { %1531 = vmatpush.msra.mxu2 %v368_v24 }
  0x5b   : > { %402 = vmatpush.msra.mxu0 %v367_v25 }
  0x5c   : > { %1532 = vmatpush.msra.mxu2 %v367_v25  ;;  %403 = vmatmul.f32.vlgmr.msra.gmra.mxu0 %v359_v26 }
  0x5d   : > { %415 = vmatmul.f32.vlgmr.msra.gmra.mxu2 %v363_v27 }
  0x5e   : > { %549 = vperm.xlu1 %1633, %v2035_v1   ;;  %553 = vperm.xlu2 %1631, %v2053_v8  }
  0x5f   : > { %557 = vperm.xlu0 %1632, %v2076_v16  }
  0x64   : > { %406 = vmatmul.f32.gmra.mxu0 %v360_v28 }
  0x65   : > { %418 = vmatmul.f32.gmra.mxu2 %v364_v29 }
  0x66   : > { %561 = vperm.xlu1 %1633, %v2071_v15   ;;  %1634 = vset.pattern.permute.xlu2 %v1858_v30 }
  0x67   : > { %1635 = vset.pattern.permute.xlu0 %v1858_v30  ;;  %607 = vperm.xlu2 %1634, %v2045_v3  }
  0x68   : > { %611 = vperm.xlu0 %1635, %v2063_v10  }
  0x6c   : > { %409 = vmatmul.f32.gmra.mxu0 %v361_v31 }
  0x6d   : > { %421 = vmatmul.f32.gmra.mxu2 %v365_v32 }
  0x6e   : > { %1636 = vset.pattern.permute.xlu1 %v1858_v30 }
  0x6f   : > { %615 = vperm.xlu1 %1636, %v2040_v2   ;;  %619 = vperm.xlu2 %1634, %v2058_v9  }
  0x70   : > { %1642 = vset.pattern.permute.xlu0 %v1859_v33 }
  0x71   : > { %684 = vperm.xlu0 %1642, %v2053_v8  }
  0x74   : > { %412 = vmatmul.f32.gmra.mxu0 %v362_v34 }
  0x75   : > { %424 = vmatmul.f32.gmra.mxu2 %v366_v35 }
  0x77   : > { %623 = vperm.xlu1 %1636, %v2035_v1   ;;  %1637 = vset.pattern.permute.xlu2 %v1859_v33 }
  0x78   : > { %680 = vperm.xlu2 %1637, %v2035_v1  }
  0x79   : > { %1650 = vset.pattern.permute.xlu0 %v2906_v36 }
  0x7a   : > { %892 = vperm.xlu0 %1650, %v2045_v3  }
  0x7f   : > { %1638 = vset.pattern.permute.xlu1 %v2902_v37 }
  0x80   : > { %794 = vperm.xlu1 %1638, %v2035_v1   ;;  %1639 = vset.pattern.permute.xlu2 %v1858_v30 }
  0x81   : > { %627 = vperm.xlu2 %1639, %v2053_v8  }
  0x82   : > { %1651 = vset.pattern.permute.xlu0 %v2902_v37 }
  0x83   : > { %798 = vperm.xlu0 %1651, %v2053_v8  }
  0x88   : > { %1640 = vset.pattern.permute.xlu1 %v1859_v33 }
  0x89   : > { %664 = vperm.xlu1 %1640, %v2045_v3   ;;  %1641 = vset.pattern.permute.xlu2 %v1862_v38 }
  0x8a   : > { %851 = vperm.xlu2 %1641, %v2035_v1  }
  0x8b   : > { %782 = vperm.xlu0 %1651, %v2063_v10  }
  0x91   : > { %1643 = vset.pattern.permute.xlu1 %v2904_v39 }
  0x92   : > { %721 = vperm.xlu1 %1643, %v2045_v3   ;;  %1644 = vset.pattern.permute.xlu2 %v2906_v36 }
  0x93   : > { %1654 = vset.pattern.permute.xlu0 %v2904_v39  ;;  %908 = vperm.xlu2 %1644, %v2035_v1  }
  0x94   : > { %737 = vperm.xlu0 %1654, %v2035_v1   ;;  %v2127_v40 = vpop.permute.xlu2 %489 }
  0x9a   : > { %741 = vperm.xlu1 %1643, %v2053_v8  }
  0x9b   : > { %1645 = vset.pattern.permute.xlu2 %v2902_v37 }
  0x9c   : > { %749 = vperm.xlu0 %1654, %v2071_v15   ;;  %778 = vperm.xlu2 %1645, %v2045_v3  }
  0x9d   : > { %v2133_v41 = vpop.permute.xlu2 %494 }
  0xa2   : > { %1646 = vset.pattern.permute.xlu1 %v1862_v38 }
  0xa3   : > { %835 = vperm.xlu1 %1646, %v2045_v3   ;;  %v2210_v3 = vshrl.u32 %v448_v62, 7 }
  0xa4   : > { %1662 = vset.pattern.permute.xlu0 %v1862_v38  ;;  %1647 = vset.pattern.permute.xlu2 %v1858_v30 }
  0xa5   : > { %859 = vperm.xlu0 %1662, %v2076_v16   ;;  %631 = vperm.xlu2 %1647, %v2076_v16   ;;  %vm450_vm0 = vcmp.lt.s32.totalorder %v2210_v3, 1  ;;  %vm597_vm1 = vcmp.lt.s32.totalorder %v2210_v3, 7 }
  0xa8   : > { %v2141_v42 = vpop.permute.xlu2 %533 }
  0xab   : > { %1648 = vset.pattern.permute.xlu1 %v1859_v33 }
  0xac   : > { %668 = vperm.xlu1 %1648, %v2063_v10  }
  0xad   : > { %v2145_v43 = vpop.permute.xlu1 %479  ;;  %863 = vperm.xlu0 %1662, %v2071_v15   ;;  %1649 = vset.pattern.permute.xlu2 %v1862_v38  ;;  %v2149_v44 = vpop.permute.xlu0 %469 }
  0xae   : > { %855 = vperm.xlu2 %1649, %v2053_v8  }
  0xb0   : > { %v2152_v45 = vpop.permute.xlu2 %545 }
  0xb4   : > { %688 = vperm.xlu1 %1648, %v2076_v16  }
  0xb5   : > { %847 = vperm.xlu0 %1662, %v2058_v9   ;;  %v2156_v46 = vpop.permute.xlu1 %484 }
  0xb6   : > { %v2158_v47 = vpop.permute.xlu0 %474  ;;  %1652 = vset.pattern.permute.xlu2 %v2904_v39 }
  0xb7   : > { %725 = vperm.xlu2 %1652, %v2063_v10  }
  0xb8   : > { %v2162_v48 = vpop.permute.xlu2 %553 }
  0xbc   : > { %1653 = vset.pattern.permute.xlu1 %v2906_v36 }
  0xbd   : > { %912 = vperm.xlu1 %1653, %v2053_v8   ;;  %1670 = vset.pattern.permute.xlu0 %v2906_v36  ;;  %v428_v8 = vld [vmem:[%s2895_s4] sm:$0x7] }
  0xbe   : > { %v2167_v49 = vpop.permute.xlu1 %504  ;;  %v2169_v50 = vpop.permute.xlu0 %499  ;;  %v2233_v14 = vperm.slane %v428_v8, 0 }
  0xbf   : > { %745 = vperm.xlu2 %1652, %v2076_v16  }
  0xc1   : > { %v2172_v51 = vpop.permute.xlu2 %607 }
  0xc5   : > { %1655 = vset.pattern.permute.xlu1 %v2902_v37 }
  0xc6   : > { %802 = vperm.xlu1 %1655, %v2076_v16  }
  0xc7   : > { %1656 = vset.pattern.permute.xlu2 %v1862_v38 }
  0xc8   : > { %v542_v52 = vpop.permute.xlu1 %541  ;;  %839 = vperm.xlu2 %1656, %v2063_v10  }
  0xc9   : > { %v2178_v53 = vpop.permute.xlu0 %537  ;;  %v2180_v54 = vpop.permute.xlu2 %619 }
  0xce   : > { %1657 = vset.pattern.permute.xlu1 %v1858_v30 }
  0xcf   : > { %635 = vperm.xlu1 %1657, %v2071_v15  }
  0xd0   : > { %v2184_v55 = vpop.permute.xlu1 %549  ;;  %1658 = vset.pattern.permute.xlu2 %v1859_v33 }
  0xd1   : > { %v2187_v56 = vpop.permute.xlu0 %557  ;;  %672 = vperm.xlu2 %1658, %v2040_v2  }
  0xd2   : > { %v2190_v57 = vpop.permute.xlu2 %680 }
  0xd7   : > { %1659 = vset.pattern.permute.xlu1 %v2906_v36 }
  0xd8   : > { %v2193_v58 = vpop.permute.xlu1 %561  ;;  %896 = vperm.xlu1 %1659, %v2063_v10  }
  0xd9   : > { %692 = vperm.xlu2 %1658, %v2071_v15   ;;  %v404_v59 = vpop.f32.mrf.mxu0 }
  0xda   : > { %v2197_v60 = vpop.permute.xlu0 %611  ;;  %v2207_v0 = vadd.f32 %v2204_v63, %v404_v59 }
  0xdb   : > { %v2199_v61 = vpop.permute.xlu2 %627 }
  0xdc   : > { %v2905_v10 = vrot.slane %v2207_v0, 7 }
  0xe0   : > { %v416_v1 = vpop.f32.mrf.mxu2  ;;  %1660 = vset.pattern.permute.xlu1 %v2904_v39 }
  0xe1   : > { %v616_v4 = vpop.permute.xlu1 %615  ;;  %729 = vperm.xlu1 %1660, %v2040_v2   ;;  %1661 = vset.pattern.permute.xlu2 %v2906_v36  ;;  %v407_v5 = vpop.f32.mrf.mxu0  ;;  %v2239_v18 = vadd.f32 %v2204_v63, %v416_v1 }
  0xe2   : > { %v2215_v6 = vadd.f32 %v2204_v63, %v407_v5  ;;  %916 = vperm.xlu2 %1661, %v2076_v16   ;;  %v2235_v16 = vperm.slane %v428_v8, 1 }
  0xe3   : > { %v2218_v7 = vpop.permute.xlu0 %684  ;;  %2928 = vst [vmem:[#allocation13_spill] sm:$0xff] %v2239_v18  ;;  %v444_v26 = vrot.slane %v2239_v18, 7 }
  0xe4   : > { %2927 = vst [vmem:[#allocation12_spill] sm:$0xff] %v2215_v6  ;;  %v2225_v11 = vpop.permute.xlu2 %851  ;;  %v441_v12 = vrot.slane %v2215_v6, 7  ;;  %v566_v17 = vmul.f32 %v542_v52, %v2215_v6  ;;  %v2907_v30 = vrot.slane %v2215_v6, 1  ;;  %v2279_v52 = vperm.slane %v428_v8, 2 }
  0xe5   : > { %v565_v8 = vmul.f32 %v2178_v53, %v2207_v0 }
  0xe6   : > { %v2245_v19 = vsel %vm450_vm0, %v2905_v10, %v441_v12  ;;  %v575_v22 = vmul.f32 %v2235_v16, %v566_v17 }
  0xe7   : > { %v509_v21 = vmul.f32 %v2145_v43, %v2245_v19  ;;  %v2312_v53 = vmul.f32 %v2235_v16, %v565_v8 }
  0xe8   : > { %v419_v20 = vpop.f32.mrf.mxu2 }
  0xe9   : > { %v2254_v24 = vadd.f32 %v2204_v63, %v419_v20  ;;  %v2256_v25 = vpop.permute.xlu1 %623  ;;  %1663 = vset.pattern.permute.xlu1 %v2902_v37  ;;  %v410_v27 = vpop.f32.mrf.mxu0  ;;  %v518_v28 = vmul.f32 %v2233_v14, %v509_v21 }
  0xea   : > { %786 = vperm.xlu1 %1663, %v2040_v2   ;;  %v2263_v29 = vadd.f32 %v2204_v63, %v410_v27  ;;  %1664 = vset.pattern.permute.xlu2 %v2902_v37 }
  0xeb   : > { %v445_v31 = vrot.slane %v2254_v24, 7  ;;  %806 = vperm.xlu2 %1664, %v2071_v15  }
  0xec   : > { %v2270_v32 = vpop.permute.xlu0 %892  ;;  %v2903_v34 = vrot.slane %v2263_v29, 1  ;;  %v434_v43 = vmul.f32 %v2251_v23, %v2263_v29  ;;  %v442_v1 = vrot.slane %v2263_v29, 7 }
  0xed   : > { %2929 = vst [vmem:[#allocation14_spill] sm:$0xff] %v2270_v32  ;;  %v2275_v35 = vsel %vm450_vm0, %v444_v26, %v445_v31  ;;  %v2283_v62 = vpop.permute.xlu2 %908 }
  0xee   : > { %v513_v59 = vmul.f32 %v2169_v50, %v2275_v35  ;;  %v2292_v5 = vsel %vm597_vm1, %v2907_v30, %v2903_v34  ;;  %v526_v17 = vadd.f32 %v518_v28, %v434_v43  ;;  %v2299_v50 = vld [vmem:[%s2895_s4 + $0x8] sm:$0x7]  ;;  %v2307_v37 = vsel %vm450_vm0, %v441_v12, %v442_v1 }
  0xef   : > { %2930 = vst [vmem:[#allocation15_spill] sm:$0xff] %v2292_v5  ;;  %v640_v20 = vmul.f32 %v616_v4, %v2292_v5  ;;  %v570_v28 = vmul.f32 %v2187_v56, %v2254_v24  ;;  %v2325_v56 = vperm.slane %v2231_v13, 0  ;;  %v2328_v8 = vperm.slane %v2299_v50, 0 }
  0xf0   : > { %v422_v21 = vpop.f32.mrf.mxu2  ;;  %v522_v4 = vmul.f32 %v2233_v14, %v513_v59  ;;  %v583_v12 = vadd.f32 %v575_v22, %v526_v17  ;;  %v569_v59 = vmul.f32 %v2162_v48, %v2239_v18  ;;  %v436_v22 = vmul.f32 %v2251_v23, %v2239_v18 }
  0xf1   : > { %v2303_v27 = vadd.f32 %v2204_v63, %v422_v21  ;;  %v649_v43 = vmul.f32 %v2279_v52, %v640_v20  ;;  %v413_v34 = vpop.f32.mrf.mxu0  ;;  %v510_v21 = vmul.f32 %v2156_v46, %v2307_v37  ;;  %v579_v48 = vmul.f32 %v2235_v16, %v570_v28 }
  0xf2   : > { %v2315_v39 = vpop.permute.xlu1 %794  ;;  %1665 = vset.pattern.permute.xlu1 %v1862_v38  ;;  %v2322_v10 = vadd.f32 %v2204_v63, %v413_v34  ;;  %v578_v32 = vmul.f32 %v2235_v16, %v569_v59  ;;  %v437_v59 = vmul.f32 %v2251_v23, %v2254_v24 }
  0xf3   : > { %843 = vperm.xlu1 %1665, %v2040_v2   ;;  %v446_v20 = vrot.slane %v2303_v27, 7  ;;  %1666 = vset.pattern.permute.xlu2 %v1859_v33  ;;  %v519_v38 = vmul.f32 %v2233_v14, %v510_v21  ;;  %v438_v46 = vmul.f32 %v2251_v23, %v2303_v27  ;;  %v2337_v34 = vadd.f32 %v649_v43, %v583_v12 }
  0xf4   : > { %v443_v17 = vrot.slane %v2322_v10, 7  ;;  %676 = vperm.xlu2 %1666, %v2058_v9   ;;  %v593_v33 = vrot.slane %v2239_v18, 1  ;;  %v435_v43 = vmul.f32 %v2251_v23, %v2322_v10 }
  0xf5   : > { %2931 = vst [vmem:[#allocation16_spill] sm:$0xff] %v2337_v34  ;;  %v2344_v30 = vpop.permute.xlu0 %798  ;;  %v2349_v21 = vsel %vm450_vm0, %v445_v31, %v446_v20  ;;  %v530_v12 = vadd.f32 %v522_v4, %v438_v46  ;;  %v433_v31 = vmul.f32 %v2251_v23, %v2215_v6 }
  0xf6   : > { %2932 = vst [vmem:[#allocation17_spill] sm:$0xff] %v2344_v30  ;;  %v2358_v36 = vsel %vm450_vm0, %v443_v17, %v444_v26  ;;  %v514_v34 = vmul.f32 %v2167_v49, %v2349_v21  ;;  %v2364_v30 = vpop.permute.xlu2 %778  ;;  %v2371_v46 = vsel %vm450_vm0, %v442_v1, %v443_v17  ;;  %v2373_v26 = vadd.f32 %v519_v38, %v435_v43 }
  0xf7   : > { %2933 = vst [vmem:[#allocation18_spill] sm:$0xff] %v2349_v21  ;;  %v512_v28 = vmul.f32 %v2133_v41, %v2358_v36  ;;  %v2380_v21 = vperm.slane %v2231_v13, 2  ;;  %v511_v41 = vmul.f32 %v2127_v40, %v2371_v46  ;;  %v2385_v5 = vadd.f32 %v579_v48, %v530_v12 }
  0xf8   : > { %2934 = vst [vmem:[#allocation19_spill] sm:$0xff] %v2364_v30  ;;  %v425_v4 = vpop.f32.mrf.mxu2  ;;  %v523_v18 = vmul.f32 %v2233_v14, %v514_v34  ;;  %v2937_v1 = vrot.slane %v2215_v6, 1  ;;  %v2938_v38 = vrot.slane %v2207_v0, 1  ;;  %v568_v40 = vmul.f32 %v2184_v55, %v2322_v10 }
  0xf9   : > { %2935 = vst [vmem:[#allocation20_spill] sm:$0xff] %v2371_v46  ;;  %v2377_v49 = vadd.f32 %v2204_v63, %v425_v4  ;;  %v2939_v63 = vrot.slane %v2254_v24, 1  ;;  %v2940_v17 = vmov 8   ;;  %v700_v4 = vmul.f32 %v2218_v7, %v2275_v35 }
  0xfa   : > { %2936 = vst [vmem:[#allocation21_spill] sm:$0xff] %v2385_v5  ;;  %v2393_v34 = vsel %vm597_vm1, %v2938_v38, %v2937_v1  ;;  %v520_v1 = vmul.f32 %v2233_v14, %v511_v41  ;;  %v2941_v38 = vrot.slane %v2322_v10, 1  ;;  %v2943_v46 = vmov 5  }
  0xfb   : > { %v2399_v13 = vsel %vm597_vm1, %v593_v33, %v2939_v63  ;;  %1667 = vset.pattern.permute.xlu1 %v2940_v17  ;;  %v2406_v43 = vpop.permute.xlu1 %664  ;;  %v447_v12 = vrot.slane %v2377_v49, 7  ;;  %v639_v48 = vmul.f32 %v2197_v60, %v2393_v34  ;;  %v521_v63 = vmul.f32 %v2233_v14, %v512_v28 }
  0xfc   : > { %900 = vperm.xlu1 %1667, %v2040_v2   ;;  %v2419_v55 = vsel %vm597_vm1, %v2941_v38, %v593_v33  ;;  %v2942_v17 = vrot.slane %v2207_v0, 7  ;;  %1668 = vset.pattern.permute.xlu2 %v2943_v46  ;;  %v643_v2 = vmul.f32 %v2199_v61, %v2399_v13  ;;  %v432_v33 = vmul.f32 %v2251_v23, %v2207_v0 }
  0xfd   : > { %v783_v7 = vpop.permute.xlu0 %782  ;;  %733 = vperm.xlu2 %1668, %v2058_v9   ;;  %v2442_v46 = vsel %vm450_vm0, %v446_v20, %v447_v12  ;;  %v648_v61 = vmul.f32 %v2279_v52, %v639_v48  ;;  %v577_v41 = vmul.f32 %v2235_v16, %v568_v40  ;;  %v642_v5 = vmul.f32 %v2256_v25, %v2419_v55 }
  0xfe   : > { %v2426_v60 = vsel %vm450_vm0, %v447_v12, %v2942_v17  ;;  %v2438_v38 = vmul.f32 %v783_v7, %v2307_v37  ;;  %v528_v17 = vadd.f32 %v520_v1, %v436_v22  ;;  %v529_v6 = vadd.f32 %v521_v63, %v437_v59 }
  0xff   : > { %v508_v28 = vmul.f32 %v2158_v47, %v2426_v60  ;;  %v709_v47 = vmul.f32 %v2325_v56, %v700_v4  ;;  %v595_v30 = vrot.slane %v2303_v27, 1  ;;  %v564_v7 = vmul.f32 %v2141_v42, %v2377_v49  ;;  %v2453_v1 = vpop.permute.xlu2 %631 }
 0x100   : > { %v585_v20 = vadd.f32 %v577_v41, %v528_v17  ;;  %v652_v12 = vmul.f32 %v2279_v52, %v643_v2  ;;  %v586_v48 = vadd.f32 %v578_v32, %v529_v6  ;;  %v507_v40 = vmul.f32 %v2149_v44, %v2442_v46 }
 0x101   : > { %v517_v22 = vmul.f32 %v2233_v14, %v508_v28  ;;  %v2944_v59 = vrot.slane %v2207_v0, 1  ;;  %v2945_v4 = vrot.slane %v2377_v49, 1  ;;  %v439_v42 = vmul.f32 %v2251_v23, %v2377_v49 }
 0x102   : > { %v571_v41 = vmul.f32 %v2193_v58, %v2303_v27  ;;  %v651_v6 = vmul.f32 %v2279_v52, %v642_v5  ;;  %v699_v44 = vmul.f32 %v2190_v57, %v2358_v36  ;;  %v660_v32 = vadd.f32 %v652_v12, %v586_v48 }
 0x103   : > { %v525_v25 = vadd.f32 %v517_v22, %v433_v31  ;;  %v2464_v63 = vsel %vm597_vm1, %v2945_v4, %v2944_v59  ;;  %v516_v31 = vmul.f32 %v2233_v14, %v507_v40  ;;  %v573_v17 = vmul.f32 %v2235_v16, %v564_v7 }
 0x104   : > { %920 = vperm.xlu1 %1667, %v2071_v15   ;;  %v722_v2 = vpop.permute.xlu1 %721  ;;  %v531_v22 = vadd.f32 %v523_v18, %v439_v42  ;;  %v580_v23 = vmul.f32 %v2235_v16, %v571_v41  ;;  %v659_v59 = vadd.f32 %v651_v6, %v585_v20  ;;  %v2478_v58 = vadd.f32 %v709_v47, %v660_v32 }
 0x105   : > { %v582_v28 = vadd.f32 %v2312_v53, %v525_v25  ;;  %v638_v5 = vmul.f32 %v2172_v51, %v2464_v63  ;;  %v524_v57 = vadd.f32 %v516_v31, %v432_v33  ;;  %v2946_v12 = vmov 6  }
 0x106   : > { %1669 = vset.pattern.permute.xlu2 %v2946_v12  ;;  %v738_v14 = vpop.permute.xlu0 %737  ;;  %v2485_v15 = vadd.f32 %v580_v23, %v531_v22  ;;  %v2947_v53 = vrot.slane %v2322_v10, 1  ;;  %v2948_v18 = vrot.slane %v2263_v29, 1  ;;  %v567_v47 = vmul.f32 %v2152_v45, %v2263_v29  ;;  %v1326_v22 = vld [vmem:[#allocation7 + $0x70] sm:$0xff] }
 0x107   : > { %v2483_v48 = vadd.f32 %v648_v61, %v582_v28  ;;  %v813_v51 = vmul.f32 %v2315_v39, %v2275_v35  ;;  %v708_v33 = vmul.f32 %v2325_v56, %v699_v44  ;;  %v756_v61 = vmul.f32 %v738_v14, %v2399_v13  ;;  %790 = vperm.xlu2 %1669, %v2058_v9  }
 0x108   : > { %v2493_v7 = vsel %vm597_vm1, %v2948_v18, %v2947_v53  ;;  %v2505_v40 = vperm.slane %v2299_v50, 1  ;;  %v2949_v25 = vrot.slane %v2254_v24, 1  ;;  %v581_v39 = vadd.f32 %v573_v17, %v524_v57  ;;  %v2519_v41 = vpop.permute.xlu2 %855  ;;  %v1327_v17 = vld [vmem:[#allocation7 + $0x78] sm:$0xff] }
 0x109   : > { %v641_v20 = vmul.f32 %v2180_v54, %v2493_v7  ;;  %v576_v35 = vmul.f32 %v2235_v16, %v567_v47  ;;  %v870_v4 = vmul.f32 %v2225_v11, %v2254_v24  ;;  %v716_v42 = vadd.f32 %v708_v33, %v659_v59  ;;  %1533 = vmatpush.msra.mxu3 %v1327_v17  ;;  %v1325_v47 = vld [vmem:[#allocation7 + $0x68] sm:$0xff] }
 0x10a   : > { %v2513_v45 = vsel %vm597_vm1, %v2949_v25, %v595_v30  ;;  %v765_v54 = vmul.f32 %v2380_v21, %v756_v61  ;;  %v695_v44 = vmul.f32 %v2406_v43, %v2426_v60  ;;  %v647_v32 = vmul.f32 %v2279_v52, %v638_v5  ;;  %1332 = vmatpush.msra.mxu1 %v1327_v17  ;;  %v2951_v25 = vld [vmem:[#allocation15_spill] sm:$0xff] }
 0x10b   : > { %v650_v6 = vmul.f32 %v2279_v52, %v641_v20  ;;  %v584_v31 = vadd.f32 %v576_v35, %v2373_v26  ;;  %v2527_v28 = vperm.slane %v2299_v50, 2  ;;  %v822_v16 = vmul.f32 %v2328_v8, %v813_v51  ;;  %1534 = vmatpush.msra.mxu3 %v1326_v22  ;;  %v1324_v51 = vld [vmem:[#allocation7 + $0x60] sm:$0xff] }
 0x10c   : > { %v927_v11 = vmul.f32 %v2283_v62, %v2513_v45  ;;  %v773_v24 = vadd.f32 %v765_v54, %v716_v42  ;;  %v752_v23 = vmul.f32 %v722_v2, %v2393_v34  ;;  %904 = vperm.xlu1 %1667, %v2058_v9   ;;  %v2534_v43 = vpop.permute.xlu1 %741  ;;  %v655_v59 = vadd.f32 %v647_v32, %v581_v39  ;;  %v2544_v9 = vld [vmem:[%s2896_s5] ss:$0 sm:$0xff]  ;;  %v2950_v2 = vld [vmem:[#allocation19_spill] sm:$0xff]  ;;  %v2952_v39 = vld [vmem:[#allocation14_spill] sm:$0xff] }
 0x10d   : > { %v2536_v26 = vadd.f32 %v650_v6, %v584_v31  ;;  %v879_v50 = vmul.f32 %v2505_v40, %v870_v4  ;;  %v704_v57 = vmul.f32 %v2325_v56, %v695_v44  ;;  %1333 = vmatpush.msra.mxu1 %v1326_v22  ;;  %v809_v14 = vmul.f32 %v2950_v2, %v2245_v19  ;;  %v1323_v42 = vld [vmem:[#allocation7 + $0x58] sm:$0xff]  ;;  %v1322_v44 = vld [vmem:[#allocation7 + $0x50] sm:$0xff]  ;;  %v2953_v31 = vld [vmem:[#allocation12_spill] sm:$0xff] }
 0x10e   : > { %v830_v5 = vadd.f32 %v822_v16, %v773_v24  ;;  %v936_v62 = vmul.f32 %v2527_v28, %v927_v11  ;;  %v761_v53 = vmul.f32 %v2380_v21, %v752_v23  ;;  %1535 = vmatpush.msra.mxu3 %v1325_v47  ;;  %v923_v35 = vmul.f32 %v2952_v39, %v2951_v25  ;;  %v1321_v11 = vld [vmem:[#allocation7 + $0x48] sm:$0xff] }
 0x10f   : > { %v712_v18 = vadd.f32 %v704_v57, %v655_v59  ;;  %1334 = vmatpush.msra.mxu1 %v1325_v47  ;;  %v818_v4 = vmul.f32 %v2328_v8, %v809_v14  ;;  %v1320_v59 = vld [vmem:[#allocation7 + $0x40] sm:$0xff] }
 0x110   : > { %v887_v12 = vadd.f32 %v879_v50, %v830_v5  ;;  %1536 = vmatpush.msra.mxu3 %v1324_v51  ;;  %v932_v17 = vmul.f32 %v2527_v28, %v923_v35 }
 0x111   : > { %v726_v61 = vpop.permute.xlu2 %725  ;;  %1335 = vmatpush.msra.mxu1 %v1324_v51  ;;  %v769_v54 = vadd.f32 %v761_v53, %v712_v18  ;;  %v1318_v18 = vld [vmem:[#allocation7 + $0x30] sm:$0xff] }
 0x112   : > { %v944_v33 = vadd.f32 %v936_v62, %v887_v12  ;;  %1537 = vmatpush.msra.mxu3 %v1323_v42  ;;  %v1319_v62 = vld [vmem:[#allocation7 + $0x38] sm:$0xff]  ;;  %v753_v53 = vmul.f32 %v726_v61, %v2951_v25 }
 0x113   : > { %1336 = vmatpush.msra.mxu1 %v1323_v42  ;;  %v826_v23 = vadd.f32 %v818_v4, %v769_v54  ;;  %v1317_v4 = vld [vmem:[#allocation7 + $0x28] sm:$0xff] }
 0x114   : > { %v2550_v20 = vadd.f32 %v2544_v9, %v944_v33  ;;  %1538 = vmatpush.msra.mxu3 %v1322_v44  ;;  %v762_v25 = vmul.f32 %v2380_v21, %v753_v53 }
 0x115   : > { %v836_v6 = vpop.permute.xlu1 %835  ;;  %1337 = vmatpush.msra.mxu1 %v1322_v44 }
 0x116   : > { %v2556_v32 = vmul.f32 0.70710677, %v2550_v20  ;;  %v866_v16 = vmul.f32 %v836_v6, %v2953_v31  ;;  %1539 = vmatpush.msra.mxu3 %v1321_v11 }
 0x117   : > { %1338 = vmatpush.msra.mxu1 %v1321_v11 }
 0x118   : > { %v1136_v24 = vmul.f32 %v2556_v32, %v2556_v32  ;;  %v875_v22 = vmul.f32 %v2505_v40, %v866_v16  ;;  %1540 = vmatpush.msra.mxu3 %v1320_v59  ;;  %v757_v16 = vmul.f32 %v2534_v43, %v2513_v45 }
 0x119   : > { %v2565_v5 = vpop.permute.xlu2 %745  ;;  %1339 = vmatpush.msra.mxu1 %v1320_v59 }
 0x11a   : > { %v2563_v50 = vmin.f32 %v1136_v24, 16.0  ;;  %v883_v57 = vadd.f32 %v875_v22, %v826_v23  ;;  %1541 = vmatpush.msra.mxu3 %v1319_v62  ;;  %v819_v24 = vmul.f32 %v2328_v8, %v2438_v38  ;;  %v1315_v23 = vld [vmem:[#allocation7 + $0x18] sm:$0xff]  ;;  %v766_v38 = vmul.f32 %v2380_v21, %v757_v16 }
 0x11b   : > { %1340 = vmatpush.msra.mxu1 %v1319_v62  ;;  %v2954_v62 = vld [vmem:[#allocation18_spill] sm:$0xff] }
 0x11c   : > { %v1138_v12 = vmul.f32 2.1237322e-06, %v2563_v50  ;;  %v1149_v2 = vmul.f32 3.8918573e-05, %v2563_v50  ;;  %v940_v14 = vadd.f32 %v932_v17, %v883_v57  ;;  %1542 = vmatpush.msra.mxu3 %v1318_v18 }
 0x11d   : > { %1341 = vmatpush.msra.mxu1 %v1318_v18 }
 0x11e   : > { %v1139_v47 = vadd.f32 0.00028619796, %v1138_v12  ;;  %v1150_v51 = vadd.f32 0.001143296, %v1149_v2  ;;  %v669_v33 = vpop.permute.xlu1 %668  ;;  %v2571_v39 = vadd.f32 %v2544_v9, %v940_v14  ;;  %1543 = vmatpush.msra.mxu3 %v1317_v4  ;;  %v2955_v12 = vld [vmem:[#allocation17_spill] sm:$0xff] }
 0x11f   : > { %v696_v35 = vmul.f32 %v669_v33, %v2245_v19  ;;  %v1316_v19 = vld [vmem:[#allocation7 + $0x20] sm:$0xff]  ;;  %1342 = vmatpush.msra.mxu1 %v1317_v4  ;;  %v814_v2 = vmul.f32 %v2955_v12, %v2954_v62  ;;  %v1314_v4 = vld [vmem:[#allocation7 + $0x10] sm:$0xff] }
 0x120   : > { %v1140_v42 = vmul.f32 %v1139_v47, %v2563_v50  ;;  %v1151_v54 = vmul.f32 %v1150_v51, %v2563_v50  ;;  %v2577_v61 = vmul.f32 0.70710677, %v2571_v39  ;;  %1544 = vmatpush.msra.mxu3 %v1316_v19 }
 0x121   : > { %v705_v6 = vmul.f32 %v2325_v56, %v696_v35  ;;  %1343 = vmatpush.msra.mxu1 %v1316_v19 }
 0x122   : > { %v1141_v44 = vadd.f32 0.0036580483, %v1140_v42  ;;  %v1152_v31 = vadd.f32 0.014752088, %v1151_v54  ;;  %v976_v11 = vmul.f32 %v2577_v61, %v2577_v61  ;;  %v840_v22 = vpop.permute.xlu2 %839  ;;  %1545 = vmatpush.msra.mxu3 %v1315_v23  ;;  %v1313_v42 = vld [vmem:[#allocation7 + $0x8] sm:$0xff] }
 0x123   : > { %v713_v17 = vadd.f32 %v705_v6, %v2483_v48  ;;  %v867_v57 = vmul.f32 %v840_v22, %v2263_v29  ;;  %1344 = vmatpush.msra.mxu1 %v1315_v23  ;;  %v823_v6 = vmul.f32 %v2328_v8, %v814_v2 }
 0x124   : > { %v1153_v59 = vmul.f32 %v1152_v31, %v2563_v50  ;;  %v2590_v43 = vmin.f32 %v976_v11, 16.0  ;;  %v1142_v53 = vmul.f32 %v1141_v44, %v2563_v50  ;;  %v2603_v31 = vpop.permute.xlu0 %749  ;;  %1546 = vmatpush.msra.mxu3 %v1314_v4  ;;  %v871_v11 = vmul.f32 %v2519_v41, %v2303_v27  ;;  %v2957_v27 = vld [vmem:[#allocation16_spill] sm:$0xff] }
 0x125   : > { %v770_v14 = vadd.f32 %v762_v25, %v713_v17  ;;  %v876_v48 = vmul.f32 %v2505_v40, %v867_v57  ;;  %1345 = vmatpush.msra.mxu1 %v1314_v4  ;;  %v1312_v57 = vld [vmem:[#allocation7] sm:$0xff] }
 0x126   : > { %v1154_v18 = vadd.f32 0.112945676, %v1153_v59  ;;  %v689_v47 = vpop.permute.xlu1 %688  ;;  %v978_v29 = vmul.f32 2.1237322e-06, %v2590_v43  ;;  %v989_v51 = vmul.f32 3.8918573e-05, %v2590_v43  ;;  %1547 = vmatpush.msra.mxu3 %v1313_v42 }
 0x127   : > { %v827_v33 = vadd.f32 %v819_v24, %v770_v14  ;;  %v1143_v16 = vadd.f32 0.05243302, %v1142_v53  ;;  %v774_v24 = vadd.f32 %v766_v38, %v2478_v58  ;;  %1346 = vmatpush.msra.mxu1 %v1313_v42  ;;  %v644_v14 = vmul.f32 %v2453_v1, %v2513_v45 }
 0x128   : > { %v1155_v35 = vmul.f32 %v1154_v18, %v2563_v50  ;;  %v979_v54 = vadd.f32 0.00028619796, %v978_v29  ;;  %v990_v25 = vadd.f32 0.001143296, %v989_v51  ;;  %1548 = vmatpush.msra.mxu3 %v1312_v57  ;;  %v880_v18 = vmul.f32 %v2505_v40, %v871_v11 }
 0x129   : > { %v2601_v44 = vadd.f32 %v876_v48, %v827_v33  ;;  %v1144_v58 = vmul.f32 %v1143_v16, %v2563_v50  ;;  %1347 = vmatpush.msra.mxu1 %v1312_v57  ;;  %v831_v38 = vadd.f32 %v823_v6, %v774_v24  ;;  %v2956_v48 = vrot.slane %v2377_v49, 1 }
 0x12a   : > { %v1156_v19 = vadd.f32 0.4994258, %v1155_v35  ;;  %v980_v17 = vmul.f32 %v979_v54, %v2590_v43  ;;  %v991_v22 = vmul.f32 %v990_v25, %v2590_v43  ;;  %v653_v4 = vmul.f32 %v2279_v52, %v644_v14 }
 0x12b   : > { %v673_v59 = vpop.permute.xlu2 %672  ;;  %v2624_v29 = vsel %vm597_vm1, %v595_v30, %v2956_v48  ;;  %v1145_v3 = vadd.f32 0.18741608, %v1144_v58  ;;  %v888_v54 = vadd.f32 %v880_v18, %v831_v38 }
 0x12c   : > { %v1157_v23 = vmul.f32 %v1156_v19, %v2563_v50  ;;  %v981_v12 = vadd.f32 0.0036580483, %v980_v17  ;;  %v992_v2 = vadd.f32 0.014752088, %v991_v22  ;;  %v697_v53 = vmul.f32 %v673_v59, %v2307_v37  ;;  %v860_v6 = vpop.permute.xlu0 %859 }
 0x12d   : > { %v701_v37 = vmul.f32 %v689_v47, %v2954_v62  ;;  %v758_v62 = vmul.f32 %v2565_v5, %v2624_v29  ;;  %v872_v11 = vmul.f32 %v860_v6, %v2377_v49  ;;  %v1146_v57 = vmul.f32 %v1145_v3, %v2563_v50 }
 0x12e   : > { %v2615_v41 = vadd.f32 1.0, %v1157_v23  ;;  %v993_v1 = vmul.f32 %v992_v2, %v2590_v43  ;;  %v706_v45 = vmul.f32 %v2325_v56, %v697_v53  ;;  %v982_v33 = vmul.f32 %v981_v12, %v2590_v43  ;;  %v2958_v23 = vld [vmem:[#allocation21_spill] sm:$0xff] }
 0x12f   : > { %v913_v51 = vpop.permute.xlu1 %912  ;;  %v710_v47 = vmul.f32 %v2325_v56, %v701_v37  ;;  %v661_v59 = vadd.f32 %v653_v4, %v2958_v23  ;;  %v767_v14 = vmul.f32 %v2380_v21, %v758_v62  ;;  %v881_v18 = vmul.f32 %v2505_v40, %v872_v11 }
 0x130   : > { %1674 = vrcp.f32 %v2615_v41  ;;  %v928_v35 = vmul.f32 %v913_v51, %v2624_v29  ;;  %v2634_v42 = vadd.f32 %v706_v45, %v2957_v27  ;;  %v994_v30 = vadd.f32 0.112945676, %v993_v1 }
 0x131   : > { %v983_v16 = vadd.f32 0.05243302, %v982_v33  ;;  %v718_v53 = vadd.f32 %v710_v47, %v661_v59  ;;  %v1147_v37 = vadd.f32 1.1283791, %v1146_v57  ;;  %v1170_v45 = vand.u32 2147483648, %v2615_v41 }
 0x132   : > { %v937_v25 = vmul.f32 %v2527_v28, %v928_v35  ;;  %v995_v19 = vmul.f32 %v994_v30, %v2590_v43  ;;  %v1168_v35 = vand.u32 2147483647, %v2615_v41  ;;  %vm1164_vm3 = vweird.f32 %v2615_v41 }
 0x133   : > { %v693_v17 = vpop.permute.xlu2 %692  ;;  %v984_v58 = vmul.f32 %v983_v16, %v2590_v43  ;;  %v775_v27 = vadd.f32 %v767_v14, %v718_v53  ;;  %v1148_v16 = vmul.f32 %v1147_v37, %v2556_v32  ;;  %v759_v32 = vmul.f32 %v2603_v31, %v2464_v63 }
 0x134   : > { %v945_v24 = vadd.f32 %v937_v25, %v888_v54  ;;  %v996_v12 = vadd.f32 0.4994258, %v995_v19  ;;  %v702_v62 = vmul.f32 %v693_v17, %v2442_v46  ;;  %v1171_v19 = vor.u32 1.1754944e-38, %v1170_v45 }
 0x135   : > { %v985_v30 = vadd.f32 0.18741608, %v984_v58  ;;  %vm1169_vm5 = vcmp.eq.f32.partialorder %v1168_v35, 8.507059e+37  ;;  %v964_v58 = vmul.f32 0.5, %v2550_v20 }
 0x136   : > { %v1675_v22 = vpop.eup %1674  ;;  %v2646_v5 = vadd.f32 %v2544_v9, %v945_v24  ;;  %v997_v49 = vmul.f32 %v996_v12, %v2590_v43  ;;  %v711_v53 = vmul.f32 %v2325_v56, %v702_v62  ;;  %v768_v62 = vmul.f32 %v2380_v21, %v759_v32 }
 0x137   : > { %v1160_v2 = vmul.f32 %v1675_v22, %v2615_v41  ;;  %vm1165_vm2 = vweird.f32 %v1675_v22  ;;  %v986_v41 = vmul.f32 %v985_v30, %v2590_v43 }
 0x138   : > { %v803_v38 = vpop.permute.xlu1 %802  ;;  %v2653_v1 = vmul.f32 0.70710677, %v2646_v5  ;;  %v2657_v51 = vadd.f32 1.0, %v997_v49  ;;  %vm1166_vm4 = vmor %vm1164_vm3, %vm1165_vm2 }
 0x139   : > { %v1161_v48 = vsub.f32 1.0, %v1160_v2  ;;  %v815_v50 = vmul.f32 %v803_v38, %v2442_v46 }
 0x13a   : > { %v1176_v4 = vmul.f32 %v2653_v1, %v2653_v1  ;;  %1676 = vrcp.f32 %v2657_v51  ;;  %v1008_v37 = vand.u32 2147483647, %v2657_v51  ;;  %vm1004_vm7 = vweird.f32 %v2657_v51 }
 0x13b   : > { %v1162_v33 = vmul.f32 %v1675_v22, %v1161_v48  ;;  %v824_v3 = vmul.f32 %v2328_v8, %v815_v50  ;;  %v987_v50 = vadd.f32 1.1283791, %v986_v41 }
 0x13c   : > { %v2665_v25 = vmin.f32 %v1176_v4, 16.0  ;;  %v917_v6 = vpop.permute.xlu2 %916  ;;  %v1010_v4 = vand.u32 2147483648, %v2657_v51  ;;  %vm1009_vm9 = vcmp.eq.f32.partialorder %v1008_v37, 8.507059e+37 }
 0x13d   : > { %v1163_v54 = vadd.f32 %v1675_v22, %v1162_v33  ;;  %v832_v47 = vadd.f32 %v824_v3, %v775_v27  ;;  %v929_v11 = vmul.f32 %v917_v6, %v2464_v63 }
 0x13e   : > { %v1178_v23 = vmul.f32 2.1237322e-06, %v2665_v25  ;;  %v1189_v12 = vmul.f32 3.8918573e-05, %v2665_v25 }
 0x13f   : > { %v1167_v24 = vsel %vm1166_vm4, %v1675_v22, %v1163_v54  ;;  %v889_v59 = vadd.f32 %v881_v18, %v832_v47  ;;  %v938_v46 = vmul.f32 %v2527_v28, %v929_v11  ;;  %v1011_v11 = vor.u32 1.1754944e-38, %v1010_v4 }
 0x140   : > { %v1172_v57 = vsel %vm1169_vm5, %v1171_v19, %v1167_v24  ;;  %v1179_v2 = vadd.f32 0.00028619796, %v1178_v23  ;;  %v1677_v14 = vpop.eup %1676  ;;  %v1190_v49 = vadd.f32 0.001143296, %v1189_v12 }
 0x141   : > { %v1173_v17 = vmul.f32 %v1172_v57, %v1148_v16  ;;  %v636_v22 = vpop.permute.xlu1 %635  ;;  %v946_v18 = vadd.f32 %v938_v46, %v889_v59  ;;  %v1000_v48 = vmul.f32 %v1677_v14, %v2657_v51  ;;  %vm1005_vm6 = vweird.f32 %v1677_v14 }
 0x142   : > { %v645_v38 = vmul.f32 %v636_v22, %v2624_v29  ;;  %v1180_v45 = vmul.f32 %v1179_v2, %v2665_v25  ;;  %v1191_v33 = vmul.f32 %v1190_v49, %v2665_v25  ;;  %vm1006_vm8 = vmor %vm1004_vm7, %vm1005_vm6  ;;  %v988_v57 = vmul.f32 %v987_v50, %v2577_v61 }
 0x143   : > { %v1506_v43 = vclamps-f32 %v1173_v17, 1.0  ;;  %v1001_v35 = vsub.f32 1.0, %v1000_v48  ;;  %v2685_v20 = vadd.f32 %v2544_v9, %v946_v18 }
 0x144   : > { %v654_v63 = vmul.f32 %v2279_v52, %v645_v38  ;;  %v1181_v29 = vadd.f32 0.0036580483, %v1180_v45  ;;  %v1192_v27 = vadd.f32 0.014752088, %v1191_v33 }
 0x145   : > { %v1300_v31 = vadd.f32 1.0, %v1506_v43  ;;  %v1002_v54 = vmul.f32 %v1677_v14, %v1001_v35  ;;  %v2692_v52 = vmul.f32 0.70710677, %v2685_v20  ;;  %v2712_v45 = vpop.permute.xlu2 %806 }
 0x146   : > { %v662_v3 = vadd.f32 %v654_v63, %v2485_v15  ;;  %v1193_v47 = vmul.f32 %v1192_v27, %v2665_v25  ;;  %v1182_v19 = vmul.f32 %v1181_v29, %v2665_v25 }
 0x147   : > { %v1308_v30 = vmul.f32 %v1300_v31, %v964_v58  ;;  %v1003_v16 = vadd.f32 %v1677_v14, %v1002_v54  ;;  %v1216_v24 = vmul.f32 %v2692_v52, %v2692_v52 }
 0x148   : > { %v719_v6 = vadd.f32 %v711_v53, %v662_v3  ;;  %v1194_v15 = vadd.f32 0.112945676, %v1193_v47  ;;  %v1183_v2 = vadd.f32 0.05243302, %v1182_v19 }
 0x149   : > { %1360 = vmatmul.f32.vlgmr.msra.gmra.mxu3 %v1308_v30  ;;  %v1007_v41 = vsel %vm1006_vm8, %v1677_v14, %v1003_v16  ;;  %v2703_v32 = vmin.f32 %v1216_v24, 16.0  ;;  %v960_v14 = vmul.f32 0.5, %v2571_v39 }
 0x14a   : > { %v2698_v23 = vadd.f32 %v768_v62, %v719_v6  ;;  %v897_v59 = vpop.permute.xlu1 %896  ;;  %v1012_v46 = vsel %vm1009_vm9, %v1011_v11, %v1007_v41  ;;  %v1195_v51 = vmul.f32 %v1194_v15, %v2665_v25  ;;  %v1184_v48 = vmul.f32 %v1183_v2, %v2665_v25 }
 0x14b   : > { %v924_v12 = vmul.f32 %v897_v59, %v2493_v7  ;;  %v1013_v17 = vmul.f32 %v1012_v46, %v988_v57  ;;  %v1218_v49 = vmul.f32 2.1237322e-06, %v2703_v32  ;;  %v1229_v18 = vmul.f32 3.8918573e-05, %v2703_v32 }
 0x14c   : > { %v1196_v22 = vadd.f32 0.4994258, %v1195_v51  ;;  %v1185_v29 = vadd.f32 0.18741608, %v1184_v48 }
 0x14d   : > { %v933_v53 = vmul.f32 %v2527_v28, %v924_v12  ;;  %v1502_v58 = vclamps-f32 %v1013_v17, 1.0  ;;  %v1219_v50 = vadd.f32 0.00028619796, %v1218_v49  ;;  %v1230_v37 = vadd.f32 0.001143296, %v1229_v18 }
 0x14e   : > { %v1197_v38 = vmul.f32 %v1196_v22, %v2665_v25  ;;  %v1186_v16 = vmul.f32 %v1185_v29, %v2665_v25  ;;  %v677_v59 = vpop.permute.xlu2 %676 }
 0x14f   : > { %v941_v61 = vadd.f32 %v933_v53, %v2601_v44  ;;  %v1296_v43 = vadd.f32 1.0, %v1502_v58  ;;  %v1220_v35 = vmul.f32 %v1219_v50, %v2703_v32  ;;  %v1231_v44 = vmul.f32 %v1230_v37, %v2703_v32 }
 0x150   : > { %v1198_v33 = vadd.f32 1.0, %v1197_v38  ;;  %v1187_v51 = vadd.f32 1.1283791, %v1186_v16  ;;  %v965_v16 = vmul.f32 0.5, %v2646_v5 }
 0x151   : > { %v2715_v63 = vadd.f32 %v2544_v9, %v941_v61  ;;  %v1304_v31 = vmul.f32 %v1296_v43, %v960_v14  ;;  %v1232_v27 = vadd.f32 0.014752088, %v1231_v44  ;;  %v1221_v54 = vadd.f32 0.0036580483, %v1220_v35 }
 0x152   : > { %1678 = vrcp.f32 %v1198_v33  ;;  %v1208_v17 = vand.u32 2147483647, %v1198_v33  ;;  %v1210_v2 = vand.u32 2147483648, %v1198_v33  ;;  %vm1204_vm11 = vweird.f32 %v1198_v33 }
 0x153   : > { %v730_v4 = vpop.permute.xlu1 %729  ;;  %1348 = vmatmul.f32.vlgmr.msra.gmra.mxu1 %v1304_v31  ;;  %v2721_v3 = vmul.f32 0.70710677, %v2715_v63  ;;  %v1233_v62 = vmul.f32 %v1232_v27, %v2703_v32  ;;  %v1222_v24 = vmul.f32 %v1221_v54, %v2703_v32  ;;  %v1188_v43 = vmul.f32 %v1187_v51, %v2653_v1 }
 0x154   : > { %v754_v39 = vmul.f32 %v730_v4, %v2493_v7  ;;  %v1211_v48 = vor.u32 1.1754944e-38, %v1210_v2  ;;  %vm1209_vm13 = vcmp.eq.f32.partialorder %v1208_v17, 8.507059e+37 }
 0x155   : > { %v1016_v47 = vmul.f32 %v2721_v3, %v2721_v3  ;;  %v1234_v19 = vadd.f32 0.112945676, %v1233_v62  ;;  %v1223_v58 = vadd.f32 0.05243302, %v1222_v24  ;;  %v2959_v62 = vld [vmem:[#allocation20_spill] sm:$0xff] }
 0x156   : > { %v763_v30 = vmul.f32 %v2380_v21, %v754_v39  ;;  %v698_v17 = vmul.f32 %v677_v59, %v2959_v62 }
 0x157   : > { %v2731_v11 = vmin.f32 %v1016_v47, 16.0  ;;  %v1235_v57 = vmul.f32 %v1234_v19, %v2703_v32  ;;  %v1224_v31 = vmul.f32 %v1223_v58, %v2703_v32  ;;  %v734_v29 = vpop.permute.xlu2 %733 }
 0x158   : > { %v2728_v6 = vadd.f32 %v763_v30, %v2634_v42  ;;  %v1679_v7 = vpop.eup %1678 }
 0x159   : > { %v1200_v15 = vmul.f32 %v1679_v7, %v1198_v33  ;;  %v1018_v41 = vmul.f32 2.1237322e-06, %v2731_v11  ;;  %v1029_v12 = vmul.f32 3.8918573e-05, %v2731_v11  ;;  %v1236_v25 = vadd.f32 0.4994258, %v1235_v57 }
 0x15a   : > { %vm1205_vm10 = vweird.f32 %v1679_v7  ;;  %v1225_v54 = vadd.f32 0.18741608, %v1224_v31 }
 0x15b   : > { %v1201_v42 = vsub.f32 1.0, %v1200_v15  ;;  %v1019_v53 = vadd.f32 0.00028619796, %v1018_v41  ;;  %v1030_v49 = vadd.f32 0.001143296, %v1029_v12  ;;  %v1237_v18 = vmul.f32 %v1236_v25, %v2703_v32  ;;  %vm1206_vm12 = vmor %vm1204_vm11, %vm1205_vm10  ;;  %v864_v41 = vpop.permute.xlu0 %863 }
 0x15c   : > { %v787_v46 = vpop.permute.xlu1 %786  ;;  %v1226_v51 = vmul.f32 %v1225_v54, %v2703_v32  ;;  %v873_v5 = vmul.f32 %v864_v41, %v2207_v0 }
 0x15d   : > { %v1202_v22 = vmul.f32 %v1679_v7, %v1201_v42  ;;  %v1020_v14 = vmul.f32 %v1019_v53, %v2731_v11  ;;  %v1031_v38 = vmul.f32 %v1030_v49, %v2731_v11  ;;  %v1238_v50 = vadd.f32 1.0, %v1237_v18 }
 0x15e   : > { %v811_v1 = vmul.f32 %v787_v46, %v2959_v62  ;;  %v1227_v18 = vadd.f32 1.1283791, %v1226_v51 }
 0x15f   : > { %v1203_v61 = vadd.f32 %v1679_v7, %v1202_v22  ;;  %v1032_v35 = vadd.f32 0.014752088, %v1031_v38  ;;  %1680 = vrcp.f32 %v1238_v50  ;;  %v1021_v39 = vadd.f32 0.0036580483, %v1020_v14 }
 0x160   : > { %v820_v46 = vmul.f32 %v2328_v8, %v811_v1  ;;  %v1250_v58 = vand.u32 2147483648, %v1238_v50  ;;  %v1248_v59 = vand.u32 2147483647, %v1238_v50  ;;  %v707_v14 = vmul.f32 %v2325_v56, %v698_v17 }
 0x161   : > { %v1207_v37 = vsel %vm1206_vm12, %v1679_v7, %v1203_v61  ;;  %v1033_v27 = vmul.f32 %v1032_v35, %v2731_v11  ;;  %v1022_v19 = vmul.f32 %v1021_v39, %v2731_v11  ;;  %v791_v38 = vpop.permute.xlu2 %790  ;;  %vm1244_vm15 = vweird.f32 %v1238_v50 }
 0x162   : > { %v1212_v44 = vsel %vm1209_vm13, %v1211_v48, %v1207_v37  ;;  %v828_v0 = vadd.f32 %v820_v46, %v2728_v6  ;;  %v812_v56 = vmul.f32 %v791_v38, %v2358_v36  ;;  %v1228_v6 = vmul.f32 %v1227_v18, %v2692_v52 }
 0x163   : > { %v1213_v4 = vmul.f32 %v1212_v44, %v1188_v43  ;;  %v1034_v47 = vadd.f32 0.112945676, %v1033_v27  ;;  %v1023_v53 = vadd.f32 0.05243302, %v1022_v19  ;;  %v1251_v44 = vor.u32 1.1754944e-38, %v1250_v58  ;;  %v2960_v19 = vld [vmem:[#allocation13_spill] sm:$0xff] }
 0x164   : > { %vm1249_vm1 = vcmp.eq.f32.partialorder %v1248_v59, 8.507059e+37  ;;  %v882_v36 = vmul.f32 %v2505_v40, %v873_v5  ;;  %v715_v52 = vadd.f32 %v707_v14, %v2536_v26  ;;  %v821_v1 = vmul.f32 %v2328_v8, %v812_v56 }
 0x165   : > { %v844_v33 = vpop.permute.xlu1 %843  ;;  %v1507_v30 = vclamps-f32 %v1213_v4, 1.0  ;;  %v1681_v15 = vpop.eup %1680  ;;  %v1035_v57 = vmul.f32 %v1034_v47, %v2731_v11  ;;  %v1024_v37 = vmul.f32 %v1023_v53, %v2731_v11 }
 0x166   : > { %v868_v24 = vmul.f32 %v844_v33, %v2322_v10  ;;  %v1240_v42 = vmul.f32 %v1681_v15, %v1238_v50  ;;  %v816_v10 = vmul.f32 %v2712_v45, %v2426_v60  ;;  %vm1245_vm14 = vweird.f32 %v1681_v15  ;;  %v848_v50 = vpop.permute.xlu0 %847 }
 0x167   : > { %v1301_v7 = vadd.f32 1.0, %v1507_v30  ;;  %v1036_v2 = vadd.f32 0.4994258, %v1035_v57  ;;  %v755_v60 = vmul.f32 %v734_v29, %v2419_v55  ;;  %vm1246_vm0 = vmor %vm1244_vm15, %vm1245_vm14  ;;  %v1025_v30 = vadd.f32 0.18741608, %v1024_v37 }
 0x168   : > { %v1241_v25 = vsub.f32 1.0, %v1240_v42  ;;  %v877_v22 = vmul.f32 %v2505_v40, %v868_v24  ;;  %v825_v39 = vmul.f32 %v2328_v8, %v816_v10  ;;  %v966_v24 = vmul.f32 0.5, %v2685_v20 }
 0x169   : > { %v1309_v12 = vmul.f32 %v1301_v7, %v965_v16  ;;  %v1037_v49 = vmul.f32 %v1036_v2, %v2731_v11  ;;  %v764_v33 = vmul.f32 %v2380_v21, %v755_v60 }
 0x16a   : > { %v1242_v61 = vmul.f32 %v1681_v15, %v1241_v25  ;;  %v885_v31 = vadd.f32 %v877_v22, %v828_v0  ;;  %v833_v54 = vadd.f32 %v825_v39, %v2698_v23 }
 0x16b   : > { %1363 = vmatmul.f32.gmra.mxu3 %v1309_v12  ;;  %v2759_v48 = vadd.f32 1.0, %v1037_v49  ;;  %v772_v57 = vadd.f32 %v764_v33, %v715_v52  ;;  %v1026_v12 = vmul.f32 %v1025_v30, %v2731_v11 }
 0x16c   : > { %v1243_v45 = vadd.f32 %v1681_v15, %v1242_v61  ;;  %v890_v51 = vadd.f32 %v882_v36, %v833_v54 }
 0x16d   : > { %1682 = vrcp.f32 %v2759_v48  ;;  %v829_v17 = vadd.f32 %v821_v1, %v772_v57  ;;  %v1050_v5 = vand.u32 2147483648, %v2759_v48  ;;  %v1027_v11 = vadd.f32 1.1283791, %v1026_v12 }
 0x16e   : > { %v901_v32 = vpop.permute.xlu1 %900  ;;  %v1247_v4 = vsel %vm1246_vm0, %v1681_v15, %v1243_v45  ;;  %v869_v15 = vmul.f32 %v848_v50, %v2960_v19  ;;  %v1048_v10 = vand.u32 2147483647, %v2759_v48  ;;  %vm1044_vm3 = vweird.f32 %v2759_v48 }
 0x16f   : > { %v925_v43 = vmul.f32 %v901_v32, %v2419_v55  ;;  %v1252_v29 = vsel %vm1249_vm1, %v1251_v44, %v1247_v4  ;;  %v1051_v59 = vor.u32 1.1754944e-38, %v1050_v5  ;;  %v1028_v38 = vmul.f32 %v1027_v11, %v2721_v3 }
 0x170   : > { %v1253_v27 = vmul.f32 %v1252_v29, %v1228_v6  ;;  %v878_v20 = vmul.f32 %v2505_v40, %v869_v15  ;;  %vm1049_vm5 = vcmp.eq.f32.partialorder %v1048_v10, 8.507059e+37 }
 0x171   : > { %v934_v35 = vmul.f32 %v2527_v28, %v925_v43 }
 0x172   : > { %v1508_v16 = vclamps-f32 %v1253_v27, 1.0  ;;  %v886_v40 = vadd.f32 %v878_v20, %v829_v17 }
 0x173   : > { %v942_v55 = vadd.f32 %v934_v35, %v885_v31  ;;  %v1683_v7 = vpop.eup %1682 }
 0x174   : > { %v1302_v41 = vadd.f32 1.0, %v1508_v16  ;;  %v1040_v26 = vmul.f32 %v1683_v7, %v2759_v48  ;;  %vm1045_vm2 = vweird.f32 %v1683_v7 }
 0x175   : > { %v2771_v62 = vadd.f32 %v2544_v9, %v942_v55  ;;  %vm1046_vm4 = vmor %vm1044_vm3, %vm1045_vm2 }
 0x176   : > { %v921_v47 = vpop.permute.xlu1 %920  ;;  %v1310_v46 = vmul.f32 %v1302_v41, %v966_v24 }
 0x177   : > { %v930_v21 = vmul.f32 %v921_v47, %v2393_v34  ;;  %v2780_v23 = vmul.f32 0.70710677, %v2771_v62  ;;  %v1041_v34 = vsub.f32 1.0, %v1040_v26 }
 0x178   : > { %1366 = vmatmul.f32.gmra.mxu3 %v1310_v46 }
 0x179   : > { %v939_v8 = vmul.f32 %v2527_v28, %v930_v21  ;;  %v1056_v42 = vmul.f32 %v2780_v23, %v2780_v23  ;;  %v1042_v53 = vmul.f32 %v1683_v7, %v1041_v34 }
 0x17b   : > { %v947_v2 = vadd.f32 %v939_v8, %v890_v51  ;;  %v2789_v25 = vmin.f32 %v1056_v42, 16.0  ;;  %v1043_v18 = vadd.f32 %v1683_v7, %v1042_v53 }
 0x17d   : > { %v1058_v22 = vmul.f32 2.1237322e-06, %v2789_v25  ;;  %v1069_v58 = vmul.f32 3.8918573e-05, %v2789_v25  ;;  %v2795_v49 = vadd.f32 %v2544_v9, %v947_v2  ;;  %v1047_v43 = vsel %vm1046_vm4, %v1683_v7, %v1043_v18 }
 0x17e   : > { %v905_v32 = vpop.permute.xlu1 %904  ;;  %v1052_v37 = vsel %vm1049_vm5, %v1051_v59, %v1047_v43 }
 0x17f   : > { %v926_v61 = vmul.f32 %v905_v32, %v2399_v13  ;;  %v1059_v14 = vadd.f32 0.00028619796, %v1058_v22  ;;  %v1070_v0 = vadd.f32 0.001143296, %v1069_v58  ;;  %v2801_v60 = vmul.f32 0.70710677, %v2795_v49 }
 0x180   : > { %v1053_v35 = vmul.f32 %v1052_v37, %v1028_v38 }
 0x181   : > { %v935_v45 = vmul.f32 %v2527_v28, %v926_v61  ;;  %v1060_v31 = vmul.f32 %v1059_v14, %v2789_v25  ;;  %v1071_v48 = vmul.f32 %v1070_v0, %v2789_v25  ;;  %v1256_v13 = vmul.f32 %v2801_v60, %v2801_v60 }
 0x182   : > { %v1503_v3 = vclamps-f32 %v1053_v35, 1.0  ;;  %v961_v28 = vmul.f32 0.5, %v2715_v63 }
 0x183   : > { %v943_v44 = vadd.f32 %v935_v45, %v886_v40  ;;  %v1061_v56 = vadd.f32 0.0036580483, %v1060_v31  ;;  %v1072_v6 = vadd.f32 0.014752088, %v1071_v48  ;;  %v2808_v4 = vmin.f32 %v1256_v13, 16.0 }
 0x184   : > { %v1297_v29 = vadd.f32 1.0, %v1503_v3 }
 0x185   : > { %v1073_v39 = vmul.f32 %v1072_v6, %v2789_v25  ;;  %v2812_v55 = vadd.f32 %v2544_v9, %v943_v44  ;;  %v1258_v50 = vmul.f32 2.1237322e-06, %v2808_v4  ;;  %v1269_v33 = vmul.f32 3.8918573e-05, %v2808_v4 }
 0x186   : > { %v1062_v27 = vmul.f32 %v1061_v56, %v2789_v25  ;;  %v1305_v54 = vmul.f32 %v1297_v29, %v961_v28 }
 0x187   : > { %v1074_v30 = vadd.f32 0.112945676, %v1073_v39  ;;  %v1259_v36 = vadd.f32 0.00028619796, %v1258_v50  ;;  %v1270_v52 = vadd.f32 0.001143296, %v1269_v33 }
 0x188   : > { %v2819_v1 = vmul.f32 0.70710677, %v2812_v55  ;;  %1351 = vmatmul.f32.gmra.mxu1 %v1305_v54  ;;  %v1063_v7 = vadd.f32 0.05243302, %v1062_v27 }
 0x189   : > { %v1075_v47 = vmul.f32 %v1074_v30, %v2789_v25  ;;  %v1260_v9 = vmul.f32 %v1259_v36, %v2808_v4  ;;  %v1271_v63 = vmul.f32 %v1270_v52, %v2808_v4 }
 0x18a   : > { %v1096_v16 = vmul.f32 %v2819_v1, %v2819_v1  ;;  %v1064_v26 = vmul.f32 %v1063_v7, %v2789_v25 }
 0x18b   : > { %v1076_v19 = vadd.f32 0.4994258, %v1075_v47  ;;  %v1272_v15 = vadd.f32 0.014752088, %v1271_v63  ;;  %v1261_v57 = vadd.f32 0.0036580483, %v1260_v9 }
 0x18c   : > { %v2826_v21 = vmin.f32 %v1096_v16, 16.0  ;;  %v1065_v20 = vadd.f32 0.18741608, %v1064_v26 }
 0x18d   : > { %v1077_v24 = vmul.f32 %v1076_v19, %v2789_v25  ;;  %v1273_v41 = vmul.f32 %v1272_v15, %v2808_v4  ;;  %v1262_v46 = vmul.f32 %v1261_v57, %v2808_v4  ;;  %v962_v19 = vmul.f32 0.5, %v2771_v62 }
 0x18e   : > { %v1098_v12 = vmul.f32 2.1237322e-06, %v2826_v21  ;;  %v1109_v8 = vmul.f32 3.8918573e-05, %v2826_v21  ;;  %v1066_v32 = vmul.f32 %v1065_v20, %v2789_v25 }
 0x18f   : > { %v1078_v51 = vadd.f32 1.0, %v1077_v24  ;;  %v1274_v42 = vadd.f32 0.112945676, %v1273_v41  ;;  %v1263_v53 = vadd.f32 0.05243302, %v1262_v46 }
 0x190   : > { %v1099_v17 = vadd.f32 0.00028619796, %v1098_v12  ;;  %v1110_v2 = vadd.f32 0.001143296, %v1109_v8  ;;  %v1067_v43 = vadd.f32 1.1283791, %v1066_v32 }
 0x191   : > { %1684 = vrcp.f32 %v1078_v51  ;;  %v1275_v34 = vmul.f32 %v1274_v42, %v2808_v4  ;;  %v1264_v14 = vmul.f32 %v1263_v53, %v2808_v4  ;;  %v1090_v45 = vand.u32 2147483648, %v1078_v51 }
 0x192   : > { %v1100_v11 = vmul.f32 %v1099_v17, %v2826_v21  ;;  %v1111_v10 = vmul.f32 %v1110_v2, %v2826_v21  ;;  %v1088_v48 = vand.u32 2147483647, %v1078_v51  ;;  %vm1084_vm7 = vweird.f32 %v1078_v51 }
 0x193   : > { %v1276_v5 = vadd.f32 0.4994258, %v1275_v34  ;;  %v1265_v13 = vadd.f32 0.18741608, %v1264_v14  ;;  %v1091_v56 = vor.u32 1.1754944e-38, %v1090_v45  ;;  %v1068_v39 = vmul.f32 %v1067_v43, %v2780_v23 }
 0x194   : > { %v1112_v40 = vadd.f32 0.014752088, %v1111_v10  ;;  %v1101_v59 = vadd.f32 0.0036580483, %v1100_v11  ;;  %vm1089_vm9 = vcmp.eq.f32.partialorder %v1088_v48, 8.507059e+37  ;;  %v967_v34 = vmul.f32 0.5, %v2795_v49 }
 0x195   : > { %v1277_v22 = vmul.f32 %v1276_v5, %v2808_v4  ;;  %v1266_v33 = vmul.f32 %v1265_v13, %v2808_v4 }
 0x196   : > { %v1113_v0 = vmul.f32 %v1112_v40, %v2826_v21  ;;  %v1102_v35 = vmul.f32 %v1101_v59, %v2826_v21 }
 0x197   : > { %v1685_v58 = vpop.eup %1684  ;;  %v1278_v61 = vadd.f32 1.0, %v1277_v22  ;;  %v1267_v16 = vadd.f32 1.1283791, %v1266_v33 }
 0x198   : > { %v1080_v18 = vmul.f32 %v1685_v58, %v1078_v51  ;;  %v1114_v37 = vadd.f32 0.112945676, %v1113_v0  ;;  %vm1085_vm6 = vweird.f32 %v1685_v58  ;;  %v1103_v29 = vadd.f32 0.05243302, %v1102_v35  ;;  %v1673_v0 = vld [vmem:[%s2898_s7] ss:$0 sm:$0xff] }
 0x199   : > { %1686 = vrcp.f32 %v1278_v61  ;;  %vm1086_vm8 = vmor %vm1084_vm7, %vm1085_vm6  ;;  %v1290_v47 = vand.u32 2147483648, %v1278_v61  ;;  %v1288_v23 = vand.u32 2147483647, %v1278_v61  ;;  %vm1284_vm11 = vweird.f32 %v1278_v61 }
 0x19a   : > { %v1081_v38 = vsub.f32 1.0, %v1080_v18  ;;  %v1115_v25 = vmul.f32 %v1114_v37, %v2826_v21  ;;  %v1104_v9 = vmul.f32 %v1103_v29, %v2826_v21  ;;  %v1268_v12 = vmul.f32 %v1267_v16, %v2801_v60 }
 0x19b   : > { %v1291_v57 = vor.u32 1.1754944e-38, %v1290_v47  ;;  %vm1289_vm13 = vcmp.eq.f32.partialorder %v1288_v23, 8.507059e+37 }
 0x19c   : > { %v1082_v31 = vmul.f32 %v1685_v58, %v1081_v38  ;;  %v1116_v6 = vadd.f32 0.4994258, %v1115_v25  ;;  %v1105_v41 = vadd.f32 0.18741608, %v1104_v9 }
 0x19e   : > { %v1083_v44 = vadd.f32 %v1685_v58, %v1082_v31  ;;  %v1117_v54 = vmul.f32 %v1116_v6, %v2826_v21  ;;  %v1106_v17 = vmul.f32 %v1105_v41, %v2826_v21 }
 0x19f   : > { %v1687_v3 = vpop.eup %1686 }
 0x1a0   : > { %v1087_v28 = vsel %vm1086_vm8, %v1685_v58, %v1083_v44  ;;  %v1280_v27 = vmul.f32 %v1687_v3, %v1278_v61  ;;  %v1118_v63 = vadd.f32 1.0, %v1117_v54  ;;  %vm1285_vm10 = vweird.f32 %v1687_v3 }
 0x1a1   : > { %v1092_v50 = vsel %vm1089_vm9, %v1091_v56, %v1087_v28  ;;  %vm1286_vm12 = vmor %vm1284_vm11, %vm1285_vm10  ;;  %v1107_v5 = vadd.f32 1.1283791, %v1106_v17  ;;  %v963_v61 = vmul.f32 0.5, %v2812_v55 }
 0x1a2   : > { %v1093_v30 = vmul.f32 %v1092_v50, %v1068_v39  ;;  %v1281_v36 = vsub.f32 1.0, %v1280_v27  ;;  %1688 = vrcp.f32 %v1118_v63  ;;  %v1130_v11 = vand.u32 2147483648, %v1118_v63 }
 0x1a3   : > { %v1128_v60 = vand.u32 2147483647, %v1118_v63  ;;  %vm1124_vm15 = vweird.f32 %v1118_v63  ;;  %v1108_v21 = vmul.f32 %v1107_v5, %v2819_v1 }
 0x1a4   : > { %v1504_v52 = vclamps-f32 %v1093_v30, 1.0  ;;  %v1282_v7 = vmul.f32 %v1687_v3, %v1281_v36  ;;  %v1131_v58 = vor.u32 1.1754944e-38, %v1130_v11 }
 0x1a5   : > { %vm1129_vm1 = vcmp.eq.f32.partialorder %v1128_v60, 8.507059e+37 }
 0x1a6   : > { %v1298_v15 = vadd.f32 1.0, %v1504_v52  ;;  %v1283_v24 = vadd.f32 %v1687_v3, %v1282_v7 }
 0x1a8   : > { %v1306_v4 = vmul.f32 %v1298_v15, %v962_v19  ;;  %v1287_v26 = vsel %vm1286_vm12, %v1687_v3, %v1283_v24  ;;  %v1689_v42 = vpop.eup %1688 }
 0x1a9   : > { %v1292_v51 = vsel %vm1289_vm13, %v1291_v57, %v1287_v26  ;;  %v1120_v62 = vmul.f32 %v1689_v42, %v1118_v63  ;;  %vm1125_vm14 = vweird.f32 %v1689_v42 }
 0x1aa   : > { %1354 = vmatmul.f32.gmra.mxu1 %v1306_v4  ;;  %v1293_v8 = vmul.f32 %v1292_v51, %v1268_v12  ;;  %vm1126_vm0 = vmor %vm1124_vm15, %vm1125_vm14 }
 0x1ab   : > { %v1121_v2 = vsub.f32 1.0, %v1120_v62 }
 0x1ac   : > { %v1509_v46 = vclamps-f32 %v1293_v8, 1.0 }
 0x1ad   : > { %v1122_v10 = vmul.f32 %v1689_v42, %v1121_v2 }
 0x1ae   : > { %v1303_v20 = vadd.f32 1.0, %v1509_v46 }
 0x1af   : > { %v1123_v22 = vadd.f32 %v1689_v42, %v1122_v10 }
 0x1b0   : > { %v1311_v53 = vmul.f32 %v1303_v20, %v967_v34 }
 0x1b1   : > { %v1127_v32 = vsel %vm1126_vm0, %v1689_v42, %v1123_v22 }
 0x1b2   : > { %1369 = vmatmul.f32.gmra.mxu3 %v1311_v53  ;;  %v1132_v40 = vsel %vm1129_vm1, %v1131_v58, %v1127_v32 }
 0x1b3   : > { %v1133_v49 = vmul.f32 %v1132_v40, %v1108_v21 }
 0x1b5   : > { %v1505_v18 = vclamps-f32 %v1133_v49, 1.0 }
 0x1b7   : > { %v1299_v59 = vadd.f32 1.0, %v1505_v18 }
 0x1b9   : > { %v1307_v14 = vmul.f32 %v1299_v59, %v963_v61 }
 0x1bb   : > { %1357 = vmatmul.f32.gmra.mxu1 %v1307_v14 }
 0x1cc   : > { %v1361_v38 = vpop.f32.mrf.mxu3 }
 0x1cd   : > { %v1362_v43 = vadd.f32 %v1673_v0, %v1361_v38 }
 0x1cf   : > { %1377 = vst [vmem:[%s358_s13 + $0x20] sm:$0xff] %v1362_v43 }
 0x1d0   : > { %v1349_v1 = vpop.f32.mrf.mxu1 }
 0x1d1   : > { %v1350_v45 = vadd.f32 %v1673_v0, %v1349_v1 }
 0x1d3   : > { %1373 = vst [vmem:[%s358_s13] sm:$0xff] %v1350_v45 }
 0x1ee   : > { %v1364_v37 = vpop.f32.mrf.mxu3 }
 0x1ef   : > { %v1365_v31 = vadd.f32 %v1673_v0, %v1364_v37 }
 0x1f1   : > { %1378 = vst [vmem:[%s358_s13 + $0x28] sm:$0xff] %v1365_v31 }
 0x1fb   : > { %v1367_v55 = vpop.f32.mrf.mxu3 }
 0x1fc   : > { %v1368_v48 = vadd.f32 %v1673_v0, %v1367_v55 }
 0x1fe   : > { %1379 = vst [vmem:[%s358_s13 + $0x30] sm:$0xff] %v1368_v48 }
 0x205   : > { %v1352_v35 = vpop.f32.mrf.mxu1 }
 0x206   : > { %v1353_v13 = vadd.f32 %v1673_v0, %v1352_v35 }
 0x208   : > { %1374 = vst [vmem:[%s358_s13 + $0x8] sm:$0xff] %v1353_v13 }
 0x227   : > { %v1355_v25 = vpop.f32.mrf.mxu1 }
 0x228   : > { %v1356_v44 = vadd.f32 %v1673_v0, %v1355_v25 }
 0x22a   : > { %1375 = vst [vmem:[%s358_s13 + $0x10] sm:$0xff] %v1356_v44 }
 0x235   : > { %v1370_v56 = vpop.f32.mrf.mxu3 }
 0x236   : > { %v1371_v6 = vadd.f32 %v1673_v0, %v1370_v56 }
 0x238   : > { %1380 = vst [vmem:[%s358_s13 + $0x38] sm:$0xff] %v1371_v6  ;;  %v1358_v3 = vpop.f32.mrf.mxu1 }
 0x239   : > { %v1359_v39 = vadd.f32 %v1673_v0, %v1358_v3 }
 0x23b   : > { %1376 = vst [vmem:[%s358_s13 + $0x18] sm:$0xff] %v1359_v39 }
 0x23c   : > { %1807 = shalt.err (!%p1804_p10)
}
 0x23d   : > { %s1864_s19 = smov 128   ;;  %s1865_s13 = smov 8  }
 0x23e   : > { %1559 = dma.vmem_to_hbm [thread:$0]  (%p1983_p3), %s1395_s20, 1024, %s1397_s21, %s1382_s24, %s1864_s19, %s1864_s19, %s1865_s13  }
 0x23f PF: > { %s1411_s18 = sand.u32 1, %s1838_s27   ;;  %p2961_p12 = scmp.ge.s32.totalorder %s1850_s30, 2 }
 0x240   : > { %s1412_s2 = scalar_lea.sflag [#allocation4], %s1411_s18 }
 0x241   : > { %p1573_p13 = pnand %p2961_p12, %p1946_p6 }
 0x243   : > { %p1574_p0 = pneg %p1573_p13 }
 0x245   : > { %1833 = dma.done.wait (%p1574_p0), %s1412_s2, 1024  }
 0x246   : > { %1835 = vsyncadd (%p1574_p0), %s1412_s2, 4294966272  ;;  %p22_p5 = scmp.ge.s32.totalorder %s1973_s26, 4   ;;  %s2962_s27 = smov %s1842_s28 }
 0x247   : > { %s2963_s28 = smov %s1846_s29  ;;  %s2964_s29 = smov %s1989_s15 }
 0x248   : > { %s2965_s30 = smov %s1973_s26  ;;  %24 = sbr.rel (!%p22_p5) target bundleno = 9 (0x9), region = 105 }
 0x24d   :  { %1418 = vsyncpa [#allocation3], 1 }
 0x24e   :  { %1420 = vsyncpa [#allocation3 + $0x1], 1 }
 0x24f   :  { %1421 = vsyncpa [#allocation6], 1 }
 0x250   :  { %1422 = vsyncpa [#allocation4], 1 }
 0x251   :  { %1424 = vsyncpa [#allocation4 + $0x1], 1 }

</bundles_post_ra>
